<compile_context>
chip_gen: v7x
topology: tpu7x:2x2x1
jax: 0.10.0
libtpu: 0.0.40
codegen_flags: <defaults>
</compile_context>

<pallas_src>
import functools

import jax
import jax.numpy as jnp
from jax.experimental import pallas as pl
from jax.experimental.pallas import tpu as pltpu


_NEG_SLOPE = 0.2
_BN_EPS = 1e-5


# ---------------------------------------------------------------------------
# Tiling / VMEM helpers
# ---------------------------------------------------------------------------
@functools.lru_cache(maxsize=None)
def _vmem_limit_bytes():
    """Per-generation VMEM budget: ~3/4 of physical, capped.
    v7x (64 MiB physical) -> 48 MiB; v5e/v6e (128 MiB) -> 96 MiB."""
    cap = 128 * 1024 * 1024
    try:
        cap = int(getattr(pltpu.get_tpu_info(), "vmem_capacity_bytes", cap))
    except Exception:
        pass
    return int(min(cap * 3 // 4, 96 * 1024 * 1024))


def _pick_row_tile(n, max_tile=512):
    """Largest power-of-two row tile <= max_tile dividing n; prefer >=2 tiles (megacore)."""
    tile = n
    for t in (512, 256, 128, 64, 32, 16, 8):
        if t <= max_tile and n % t == 0:
            tile = t
            break
    if tile == n and n % 2 == 0 and (n // 2) % 8 == 0:
        tile = n // 2
    return tile


def _pick_ch_tile(c, max_tile):
    """Largest multiple-of-128 tile <= max_tile dividing c (lane-dense); else whole c."""
    for t in (512, 256, 128):
        if t <= max_tile and c % t == 0:
            return t
    return c


def _compiler_params(sem):
    return pltpu.CompilerParams(dimension_semantics=sem,
                                vmem_limit_bytes=_vmem_limit_bytes())


# ---------------------------------------------------------------------------
# Stage A kernel: dilated conv1 (taps flattened into K, input LeakyReLU fused)
#                 + shortcut k=1 conv (centre tap only) + BN partial statistics
# ---------------------------------------------------------------------------
def _make_conv1_sc_kernel(nkc, neg_slope=_NEG_SLOPE):
    def kernel(xt_ref, w1_ref, wsc_ref, y1_ref, ysc_ref, st_ref, acc1_ref, accsc_ref):
        k = pl.program_id(2)

        @pl.when(k == 0)
        def _():
            acc1_ref[...] = jnp.zeros_like(acc1_ref)
            accsc_ref[...] = jnp.zeros_like(accsc_ref)

        x = xt_ref[...]                                       # [tm, tk] (MXU dtype)
        x_act = jnp.where(x >= 0, x, neg_slope * x)           # block-input LeakyReLU (fused)
        acc1_ref[...] += jnp.dot(x_act, w1_ref[...],
                                 preferred_element_type=jnp.float32)

        # Shortcut k=1 conv contracts only over the centre tap (== raw, un-activated x).
        @pl.when(jnp.logical_and(k >= nkc, k < 2 * nkc))
        def _():
            accsc_ref[...] += jnp.dot(x, wsc_ref[...],
                                      preferred_element_type=jnp.float32)

        @pl.when(k == pl.num_programs(2) - 1)
        def _():
            y1 = acc1_ref[...]
            ysc = accsc_ref[...]
            y1_ref[...] = y1.astype(y1_ref.dtype)
            ysc_ref[...] = ysc.astype(ysc_ref.dtype)
            st_ref[0] = jnp.concatenate(
                [jnp.sum(y1, axis=0, keepdims=True),
                 jnp.sum(y1 * y1, axis=0, keepdims=True),
                 jnp.sum(ysc, axis=0, keepdims=True),
                 jnp.sum(ysc * ysc, axis=0, keepdims=True)], axis=0)

    return kernel


def _conv1_shortcut_call(xt, w1, wsc, *, tm, tn, tk):
    """xt: [N, 3*Cin] taps (MXU dtype); w1: [3*Cin, Cout]; wsc: [Cin, Cout].
    Returns y1 [N,Cout] f32, ysc [N,Cout] f32, stats [n_rt, 4, Cout] f32 partial sums."""
    N, K3 = xt.shape
    cin = wsc.shape[0]
    cout = w1.shape[1]
    assert K3 == 3 * cin and cin % tk == 0 and cout % tn == 0 and N % tm == 0
    nkc = cin // tk
    n_rt, n_nt, n_kt = N // tm, cout // tn, K3 // tk

    def wsc_map(r, n, k):
        # Out-of-range k (non-centre taps) just clamps to a valid (unused) block.
        return (jnp.minimum(jnp.maximum(k - nkc, 0), nkc - 1), n)

    return pl.pallas_call(
        _make_conv1_sc_kernel(nkc),
        out_shape=(
            jax.ShapeDtypeStruct((N, cout), jnp.float32),
            jax.ShapeDtypeStruct((N, cout), jnp.float32),
            jax.ShapeDtypeStruct((n_rt, 4, cout), jnp.float32),
        ),
        grid_spec=pltpu.PrefetchScalarGridSpec(
            num_scalar_prefetch=0,
            grid=(n_rt, n_nt, n_kt),
            in_specs=[
                pl.BlockSpec((tm, tk), lambda r, n, k: (r, k)),
                pl.BlockSpec((tk, tn), lambda r, n, k: (k, n)),
                pl.BlockSpec((tk, tn), wsc_map),
            ],
            out_specs=(
                pl.BlockSpec((tm, tn), lambda r, n, k: (r, n)),
                pl.BlockSpec((tm, tn), lambda r, n, k: (r, n)),
                pl.BlockSpec((1, 4, tn), lambda r, n, k: (r, 0, n)),
            ),
            scratch_shapes=[pltpu.VMEM((tm, tn), jnp.float32),
                            pltpu.VMEM((tm, tn), jnp.float32)],
        ),
        compiler_params=_compiler_params(("parallel", "parallel", "arbitrary")),
    )(xt, w1, wsc)


# ---------------------------------------------------------------------------
# Stage B kernel: k=1 conv2 with folded BN1 + LeakyReLU fused onto its input,
#                 + BN2 partial statistics
# ---------------------------------------------------------------------------
def _make_conv2_kernel(mxu_dtype, neg_slope=_NEG_SLOPE):
    def kernel(y1_ref, s1_ref, b1_ref, w2_ref, y2_ref, st_ref, acc_ref):
        k = pl.program_id(2)

        @pl.when(k == 0)
        def _():
            acc_ref[...] = jnp.zeros_like(acc_ref)

        h = y1_ref[...] * s1_ref[...] + b1_ref[...]           # folded BN1 (f32)
        h = jnp.where(h >= 0, h, neg_slope * h)               # LeakyReLU (f32)
        acc_ref[...] += jnp.dot(h.astype(mxu_dtype), w2_ref[...],
                                preferred_element_type=jnp.float32)

        @pl.when(k == pl.num_programs(2) - 1)
        def _():
            y2 = acc_ref[...]
            y2_ref[...] = y2.astype(y2_ref.dtype)
            st_ref[0] = jnp.concatenate(
                [jnp.sum(y2, axis=0, keepdims=True),
                 jnp.sum(y2 * y2, axis=0, keepdims=True)], axis=0)

    return kernel


def _conv2_call(y1, s1, b1, w2, *, mxu_dtype, tm, tn, tk):
    N, cin = y1.shape
    cout = w2.shape[1]
    assert N % tm == 0 and cin % tk == 0 and cout % tn == 0
    n_rt, n_nt, n_kt = N // tm, cout // tn, cin // tk

    return pl.pallas_call(
        _make_conv2_kernel(mxu_dtype),
        out_shape=(
            jax.ShapeDtypeStruct((N, cout), jnp.float32),
            jax.ShapeDtypeStruct((n_rt, 2, cout), jnp.float32),
        ),
        grid_spec=pltpu.PrefetchScalarGridSpec(
            num_scalar_prefetch=0,
            grid=(n_rt, n_nt, n_kt),
            in_specs=[
                pl.BlockSpec((tm, tk), lambda r, n, k: (r, k)),
                pl.BlockSpec((1, tk), lambda r, n, k: (0, k)),
                pl.BlockSpec((1, tk), lambda r, n, k: (0, k)),
                pl.BlockSpec((tk, tn), lambda r, n, k: (k, n)),
            ],
            out_specs=(
                pl.BlockSpec((tm, tn), lambda r, n, k: (r, n)),
                pl.BlockSpec((1, 2, tn), lambda r, n, k: (r, 0, n)),
            ),
            scratch_shapes=[pltpu.VMEM((tm, tn), jnp.float32)],
        ),
        compiler_params=_compiler_params(("parallel", "parallel", "arbitrary")),
    )(y1, s1, b1, w2)


# ---------------------------------------------------------------------------
# Stage C kernel: out = BN2(y2) + BN_sc(y_sc)   (folded, row-tiled elementwise)
# ---------------------------------------------------------------------------
def _combine_kernel(y2_ref, s2_ref, b2_ref, ysc_ref, ssc_ref, bsc_ref, o_ref):
    out = (y2_ref[...] * s2_ref[...] + b2_ref[...]
           + ysc_ref[...] * ssc_ref[...] + bsc_ref[...])
    o_ref[...] = out.astype(o_ref.dtype)


def _combine_call(y2, s2, b2, ysc, ssc, bsc, *, tm, tn, out_dtype=jnp.float32):
    N, C = y2.shape
    n_rt, n_nt = N // tm, C // tn
    row = pl.BlockSpec((tm, tn), lambda r, n: (r, n))
    vec = pl.BlockSpec((1, tn), lambda r, n: (0, n))
    return pl.pallas_call(
        _combine_kernel,
        out_shape=jax.ShapeDtypeStruct((N, C), out_dtype),
        grid_spec=pltpu.PrefetchScalarGridSpec(
            num_scalar_prefetch=0,
            grid=(n_rt, n_nt),
            in_specs=[row, vec, vec, row, vec, vec],
            out_specs=row,
        ),
        compiler_params=_compiler_params(("parallel", "parallel")),
    )(y2, s2, b2, ysc, ssc, bsc)


# ---------------------------------------------------------------------------
# BatchNorm folding (from full-batch sum / sum-of-squares)
# ---------------------------------------------------------------------------
def _fold_bn(sum_, sumsq, count, gamma, beta, eps=_BN_EPS):
    mean = sum_ / count
    var = jnp.maximum(sumsq / count - mean * mean, 0.0)        # biased variance (PyTorch norm)
    scale = gamma * jax.lax.rsqrt(var + eps)
    shift = beta - mean * scale
    return scale.reshape(1, -1), shift.reshape(1, -1)


# ---------------------------------------------------------------------------
# residual_conv forward
# ---------------------------------------------------------------------------
def residual_conv_forward(x_ncl, params, *, mxu_dtype=jnp.bfloat16):
    """x_ncl: [B, C, L] (PyTorch Conv1d layout).  params: list of per-block dicts with
    c1_w[3,C,C], c1_gamma[C], c1_beta[C], c2_w[1,C,C], c2_gamma, c2_beta,
    sc_w[1,C,C], sc_gamma, sc_beta.  Conv1d biases are omitted: BatchNorm cancels them."""
    B, C, L = x_ncl.shape
    N = B * L
    x = jnp.transpose(x_ncl, (0, 2, 1)).astype(jnp.float32)    # channels-last [B, L, C]

    tm = _pick_row_tile(N)
    tn = _pick_ch_tile(C, 256)
    tk = _pick_ch_tile(C, 512)

    for i, p in enumerate(params):
        d = 3 ** i
        w1 = p['c1_w'].reshape(3 * C, C).astype(mxu_dtype)     # tap-major rows, matches xt cols
        wsc = p['sc_w'].reshape(C, C).astype(mxu_dtype)
        w2 = p['c2_w'].reshape(C, C).astype(mxu_dtype)

        # Reflection pad, then flatten the 3 dilated taps into the contraction dim -> [N, 3C].
        # (LeakyReLU is elementwise, so it commutes with the padding and is applied in-kernel.)
        xp = jnp.pad(x, ((0, 0), (d, d), (0, 0)), mode='reflect')
        xt = jnp.concatenate(
            [xp[:, 0:L], xp[:, d:d + L], xp[:, 2 * d:2 * d + L]],
            axis=-1).reshape(N, 3 * C).astype(mxu_dtype)       # centre tap == raw x

        # Stage A: dilated conv1 (+fused input LeakyReLU) and shortcut conv, + BN partial stats.
        y1, ysc, st = _conv1_shortcut_call(xt, w1, wsc, tm=tm, tn=tn, tk=tk)
        s = jnp.sum(st, axis=0)                                # [4, C] full-batch sums (tiny)
        sc1, sh1 = _fold_bn(s[0], s[1], N, p['c1_gamma'], p['c1_beta'])
        scs, shs = _fold_bn(s[2], s[3], N, p['sc_gamma'], p['sc_beta'])

        # Stage B: conv2 (k=1) with folded BN1 + LeakyReLU fused onto its input, + BN2 stats.
        y2, st2 = _conv2_call(y1, sc1, sh1, w2, mxu_dtype=mxu_dtype, tm=tm, tn=tn, tk=tk)
        s2 = jnp.sum(st2, axis=0)
        sc2, sh2 = _fold_bn(s2[0], s2[1], N, p['c2_gamma'], p['c2_beta'])

        # Stage C: residual sum of the two folded-BN outputs.
        out = _combine_call(y2, sc2, sh2, ysc, scs, shs, tm=tm, tn=tn)
        x = out.reshape(B, L, C)

    return jnp.transpose(x, (0, 2, 1))                         # back to [B, C, L]


# ---------------------------------------------------------------------------
# Pure-JAX reference (training-mode BatchNorm, same weight layout)
# ---------------------------------------------------------------------------
def _lrelu(x, s=_NEG_SLOPE):
    return jnp.where(x >= 0, x, s * x)


def _bn_ref(y_blc, gamma, beta, eps=_BN_EPS):
    mean = jnp.mean(y_blc, axis=(0, 1), keepdims=True)
    var = jnp.mean((y_blc - mean) ** 2, axis=(0, 1), keepdims=True)
    return (y_blc - mean) * jax.lax.rsqrt(var + eps) * gamma + beta


def _conv_ref(x_blc, w_kio, dilation, dot_dtype):
    K = w_kio.shape[0]
    prec = jax.lax.Precision.HIGHEST if dot_dtype == jnp.float32 else jax.lax.Precision.DEFAULT

    def _dot(a, w):
        return jnp.einsum('blc,cd->bld', a.astype(dot_dtype), w.astype(dot_dtype),
                          precision=prec, preferred_element_type=jnp.float32)

    if K == 1:
        return _dot(x_blc, w_kio[0])
    d, L = dilation, x_blc.shape[1]
    xp = jnp.pad(x_blc, ((0, 0), (d, d), (0, 0)), mode='reflect')
    out = jnp.zeros((x_blc.shape[0], L, w_kio.shape[2]), jnp.float32)
    for t in range(K):
        out = out + _dot(xp[:, t * d:t * d + L, :], w_kio[t])
    return out


def residual_conv_reference(x_ncl, params, dot_dtype=jnp.float32):
    x = jnp.transpose(x_ncl, (0, 2, 1)).astype(jnp.float32)
    for i, p in enumerate(params):
        d = 3 ** i
        s = _bn_ref(_conv_ref(x, p['sc_w'], 1, dot_dtype), p['sc_gamma'], p['sc_beta'])
        h = _lrelu(x)
        h = _bn_ref(_conv_ref(h, p['c1_w'], d, dot_dtype), p['c1_gamma'], p['c1_beta'])
        h = _lrelu(h)
        h = _bn_ref(_conv_ref(h, p['c2_w'], 1, dot_dtype), p['c2_gamma'], p['c2_beta'])
        x = s + h
    return jnp.transpose(x, (0, 2, 1))


# ---------------------------------------------------------------------------
if __name__ == "__main__":
    B, C, L = 2, 128, 32          # channels = 128 -> lane-dense tiles; L > 3**2 for reflect pad
    n_blocks = 3

    key = jax.random.PRNGKey(0)
    key, kx = jax.random.split(key)
    x = jax.random.normal(kx, (B, C, L), jnp.float32)

    def _uniform(k, shape, fan_in):
        bnd = 1.0 / (fan_in ** 0.5)
        return jax.random.uniform(k, shape, jnp.float32, -bnd, bnd)

    # Weights created in [taps, C_in, C_out] layout (flattened to [3*C_in, C_out] inside forward).
    params = []
    for i in range(n_blocks):
        ks = jax.random.split(jax.random.fold_in(key, i), 9)
        params.append(dict(
            c1_w=_uniform(ks[0], (3, C, C), 3 * C),
            c1_gamma=1.0 + 0.1 * jax.random.normal(ks[1], (C,), jnp.float32),
            c1_beta=0.1 * jax.random.normal(ks[2], (C,), jnp.float32),
            c2_w=_uniform(ks[3], (1, C, C), C),
            c2_gamma=1.0 + 0.1 * jax.random.normal(ks[4], (C,), jnp.float32),
            c2_beta=0.1 * jax.random.normal(ks[5], (C,), jnp.float32),
            sc_w=_uniform(ks[6], (1, C, C), C),
            sc_gamma=1.0 + 0.1 * jax.random.normal(ks[7], (C,), jnp.float32),
            sc_beta=0.1 * jax.random.normal(ks[8], (C,), jnp.float32),
        ))

    # 1) f32 MXU-operand path: tight structural check against the HIGHEST-precision reference.
    fwd_f32 = jax.jit(functools.partial(residual_conv_forward, mxu_dtype=jnp.float32))
    out_f32 = jax.block_until_ready(fwd_f32(x, params))
    ref_f32 = residual_conv_reference(x, params, dot_dtype=jnp.float32)
    assert out_f32.shape == (B, C, L)
    err_f32 = float(jnp.max(jnp.abs(out_f32 - ref_f32)))
    assert jnp.allclose(out_f32, ref_f32, atol=5e-3, rtol=5e-3), f"f32 max abs err = {err_f32}"

    # 2) bf16 MXU-operand path (default, v6e/v7x-preferred): structural correctness is already
    #    covered by the f32 check, so here we bound the whole-tensor relative error (bf16 operand
    #    rounding makes elementwise max-error comparisons against f32 uninformative).
    fwd_bf16 = jax.jit(functools.partial(residual_conv_forward, mxu_dtype=jnp.bfloat16))
    out_bf16 = jax.block_until_ready(fwd_bf16(x, params))
    ref_bf16 = residual_conv_reference(x, params, dot_dtype=jnp.bfloat16)
    assert out_bf16.shape == (B, C, L)
    rel = float(jnp.linalg.norm(out_bf16 - ref_bf16) / jnp.linalg.norm(ref_bf16))
    assert rel < 3e-2, f"bf16 path relative L2 error = {rel}"

    print("KERNEL_OK")
</pallas_src>

<mosaic_0001>
module attributes {stable_mosaic.version = 11 : i64} {
  func.func @kernel(%arg0: i32, %arg1: i32, %arg2: i32, %arg3: memref<32x128xf32, #tpu.memory_space<vmem>>, %arg4: memref<128x128xf32, #tpu.memory_space<vmem>>, %arg5: memref<128x128xf32, #tpu.memory_space<vmem>>, %arg6: memref<32x128xf32, #tpu.memory_space<vmem>>, %arg7: memref<32x128xf32, #tpu.memory_space<vmem>>, %arg8: memref<1x4x128xf32, #tpu.memory_space<vmem>>, %arg9: memref<32x128xf32, #tpu.memory_space<vmem>>, %arg10: memref<32x128xf32, #tpu.memory_space<vmem>>) attributes {dimension_semantics = [#tpu.dimension_semantics<parallel>, #tpu.dimension_semantics<parallel>, #tpu.dimension_semantics<arbitrary>], iteration_bounds = array<i64: 2, 1, 3>, scalar_prefetch = 0 : i64, scratch_operands = 2 : i64, tpu.core_type = #tpu.core_type<tc>, window_params = [{transform_indices = @transform_0, window_bounds = array<i64: 32, 128>}, {transform_indices = @transform_1, window_bounds = array<i64: 128, 128>}, {transform_indices = @transform_2, window_bounds = array<i64: 128, 128>}, {transform_indices = @transform_3, window_bounds = array<i64: 32, 128>}, {transform_indices = @transform_4, window_bounds = array<i64: 32, 128>}, {transform_indices = @transform_5, window_bounds = array<i64: 1, 4, 128>}]} {
    %c0_i32 = arith.constant 0 : i32
    %0 = arith.cmpi eq, %arg2, %c0_i32 : i32
    %1 = arith.extui %0 : i1 to i32
    %c0_i32_0 = arith.constant 0 : i32
    %2 = arith.cmpi ne, %1, %c0_i32_0 : i32
    scf.if %2 {
      %cst_13 = arith.constant 0.000000e+00 : f32
      %22 = vector.broadcast %cst_13 : f32 to vector<32x128xf32>
      %c0_14 = arith.constant 0 : index
      %c0_15 = arith.constant 0 : index
      %23 = vector.load %arg9[%c0_14, %c0_15] : memref<32x128xf32, #tpu.memory_space<vmem>>, vector<32x128xf32>
      tpu.vector_store %arg9[%c0_14, %c0_15], %22 {strides = array<i32>} : memref<32x128xf32, #tpu.memory_space<vmem>>, vector<32x128xf32>,
      %cst_16 = arith.constant 0.000000e+00 : f32
      %24 = vector.broadcast %cst_16 : f32 to vector<32x128xf32>
      %c0_17 = arith.constant 0 : index
      %c0_18 = arith.constant 0 : index
      %25 = vector.load %arg10[%c0_17, %c0_18] : memref<32x128xf32, #tpu.memory_space<vmem>>, vector<32x128xf32>
      tpu.vector_store %arg10[%c0_17, %c0_18], %24 {strides = array<i32>} : memref<32x128xf32, #tpu.memory_space<vmem>>, vector<32x128xf32>,
    } else {
    }
    %c0 = arith.constant 0 : index
    %c0_1 = arith.constant 0 : index
    %3 = vector.load %arg3[%c0, %c0_1] : memref<32x128xf32, #tpu.memory_space<vmem>>, vector<32x128xf32>
    %cst = arith.constant 0.000000e+00 : f32
    %4 = vector.broadcast %cst : f32 to vector<32x128xf32>
    %5 = arith.cmpf oge, %3, %4 : vector<32x128xf32>
    %cst_2 = arith.constant 2.000000e-01 : f32
    %6 = vector.broadcast %cst_2 : f32 to vector<32x128xf32>
    %7 = arith.mulf %6, %3 : vector<32x128xf32>
    %8 = arith.select %5, %3, %7 : vector<32x128xi1>, vector<32x128xf32>
    %c0_3 = arith.constant 0 : index
    %c0_4 = arith.constant 0 : index
    %9 = vector.load %arg9[%c0_3, %c0_4] : memref<32x128xf32, #tpu.memory_space<vmem>>, vector<32x128xf32>
    %c0_5 = arith.constant 0 : index
    %c0_6 = arith.constant 0 : index
    %10 = vector.load %arg4[%c0_5, %c0_6] : memref<128x128xf32, #tpu.memory_space<vmem>>, vector<128x128xf32>
    %cst_7 = arith.constant dense<0.000000e+00> : vector<32x128xf32>
    %11 = tpu.matmul %8, %10, %cst_7 {dimension_numbers = #tpu.dot_dimension_numbers<[1], [0], [0], [1], [0, 0, 1, 1], [], []>} : vector<32x128xf32>, vector<128x128xf32>, vector<32x128xf32> -> vector<32x128xf32>
    %12 = arith.addf %9, %11 : vector<32x128xf32>
    %c0_8 = arith.constant 0 : index
    %c0_9 = arith.constant 0 : index
    %13 = vector.load %arg9[%c0_8, %c0_9] : memref<32x128xf32, #tpu.memory_space<vmem>>, vector<32x128xf32>
    tpu.vector_store %arg9[%c0_8, %c0_9], %12 {strides = array<i32>} : memref<32x128xf32, #tpu.memory_space<vmem>>, vector<32x128xf32>,
    %c1_i32 = arith.constant 1 : i32
    %14 = arith.cmpi sge, %arg2, %c1_i32 : i32
    %c2_i32 = arith.constant 2 : i32
    %15 = arith.cmpi slt, %arg2, %c2_i32 : i32
    %16 = arith.andi %14, %15 : i1
    %17 = arith.extui %16 : i1 to i32
    %c0_i32_10 = arith.constant 0 : i32
    %18 = arith.cmpi ne, %17, %c0_i32_10 : i32
    scf.if %18 {
      %c0_13 = arith.constant 0 : index
      %c0_14 = arith.constant 0 : index
      %22 = vector.load %arg10[%c0_13, %c0_14] : memref<32x128xf32, #tpu.memory_space<vmem>>, vector<32x128xf32>
      %c0_15 = arith.constant 0 : index
      %c0_16 = arith.constant 0 : index
      %23 = vector.load %arg5[%c0_15, %c0_16] : memref<128x128xf32, #tpu.memory_space<vmem>>, vector<128x128xf32>
      %cst_17 = arith.constant dense<0.000000e+00> : vector<32x128xf32>
      %24 = tpu.matmul %3, %23, %cst_17 {dimension_numbers = #tpu.dot_dimension_numbers<[1], [0], [0], [1], [0, 0, 1, 1], [], []>} : vector<32x128xf32>, vector<128x128xf32>, vector<32x128xf32> -> vector<32x128xf32>
      %25 = arith.addf %22, %24 : vector<32x128xf32>
      %c0_18 = arith.constant 0 : index
      %c0_19 = arith.constant 0 : index
      %26 = vector.load %arg10[%c0_18, %c0_19] : memref<32x128xf32, #tpu.memory_space<vmem>>, vector<32x128xf32>
      tpu.vector_store %arg10[%c0_18, %c0_19], %25 {strides = array<i32>} : memref<32x128xf32, #tpu.memory_space<vmem>>, vector<32x128xf32>,
    } else {
    }
    %c2_i32_11 = arith.constant 2 : i32
    %19 = arith.cmpi eq, %arg2, %c2_i32_11 : i32
    %20 = arith.extui %19 : i1 to i32
    %c0_i32_12 = arith.constant 0 : i32
    %21 = arith.cmpi ne, %20, %c0_i32_12 : i32
    scf.if %21 {
      %c0_13 = arith.constant 0 : index
      %c0_14 = arith.constant 0 : index
      %22 = vector.load %arg9[%c0_13, %c0_14] : memref<32x128xf32, #tpu.memory_space<vmem>>, vector<32x128xf32>
      %c0_15 = arith.constant 0 : index
      %c0_16 = arith.constant 0 : index
      %23 = vector.load %arg10[%c0_15, %c0_16] : memref<32x128xf32, #tpu.memory_space<vmem>>, vector<32x128xf32>
      %c0_17 = arith.constant 0 : index
      %c0_18 = arith.constant 0 : index
      %24 = vector.load %arg6[%c0_17, %c0_18] : memref<32x128xf32, #tpu.memory_space<vmem>>, vector<32x128xf32>
      tpu.vector_store %arg6[%c0_17, %c0_18], %22 {strides = array<i32>} : memref<32x128xf32, #tpu.memory_space<vmem>>, vector<32x128xf32>,
      %c0_19 = arith.constant 0 : index
      %c0_20 = arith.constant 0 : index
      %25 = vector.load %arg7[%c0_19, %c0_20] : memref<32x128xf32, #tpu.memory_space<vmem>>, vector<32x128xf32>
      tpu.vector_store %arg7[%c0_19, %c0_20], %23 {strides = array<i32>} : memref<32x128xf32, #tpu.memory_space<vmem>>, vector<32x128xf32>,
      %cst_21 = arith.constant dense<0.000000e+00> : vector<128xf32>
      %26 = vector.multi_reduction <add>, %22, %cst_21 [0] : vector<32x128xf32> to vector<128xf32>
      %27 = vector.shape_cast %26 : vector<128xf32> to vector<1x128xf32>
      %28 = arith.mulf %22, %22 : vector<32x128xf32>
      %cst_22 = arith.constant dense<0.000000e+00> : vector<128xf32>
      %29 = vector.multi_reduction <add>, %28, %cst_22 [0] : vector<32x128xf32> to vector<128xf32>
      %30 = vector.shape_cast %29 : vector<128xf32> to vector<1x128xf32>
      %cst_23 = arith.constant dense<0.000000e+00> : vector<128xf32>
      %31 = vector.multi_reduction <add>, %23, %cst_23 [0] : vector<32x128xf32> to vector<128xf32>
      %32 = vector.shape_cast %31 : vector<128xf32> to vector<1x128xf32>
      %33 = arith.mulf %23, %23 : vector<32x128xf32>
      %cst_24 = arith.constant dense<0.000000e+00> : vector<128xf32>
      %34 = vector.multi_reduction <add>, %33, %cst_24 [0] : vector<32x128xf32> to vector<128xf32>
      %35 = vector.shape_cast %34 : vector<128xf32> to vector<1x128xf32>
      %36 = tpu.concatenate %27, %30, %32, %35 in 0 : vector<1x128xf32>, vector<1x128xf32>, vector<1x128xf32>, vector<1x128xf32> -> vector<4x128xf32>
      %c0_25 = arith.constant 0 : index
      %c0_26 = arith.constant 0 : index
      %c0_27 = arith.constant 0 : index
      %37 = vector.load %arg8[%c0_25, %c0_26, %c0_27] : memref<1x4x128xf32, #tpu.memory_space<vmem>>, vector<1x4x128xf32>
      %38 = vector.shape_cast %37 : vector<1x4x128xf32> to vector<4x128xf32>
      %39 = vector.shape_cast %36 : vector<4x128xf32> to vector<1x4x128xf32>
      tpu.vector_store %arg8[%c0_25, %c0_26, %c0_27], %39 {strides = array<i32>} : memref<1x4x128xf32, #tpu.memory_space<vmem>>, vector<1x4x128xf32>,
    } else {
    }
    return
  }
  func.func @transform_0(%arg0: i32, %arg1: i32, %arg2: i32) -> (i32, i32) {
    %c0_i32 = arith.constant 0 : i32
    return %arg0, %arg2 : i32, i32
  }
  func.func @transform_1(%arg0: i32, %arg1: i32, %arg2: i32) -> (i32, i32) {
    %c0_i32 = arith.constant 0 : i32
    return %arg2, %arg1 : i32, i32
  }
  func.func @transform_2(%arg0: i32, %arg1: i32, %arg2: i32) -> (i32, i32) {
    %c1_i32 = arith.constant 1 : i32
    %0 = arith.subi %arg2, %c1_i32 : i32
    %c0_i32 = arith.constant 0 : i32
    %1 = arith.maxsi %0, %c0_i32 : i32
    %c0_i32_0 = arith.constant 0 : i32
    %2 = arith.minsi %1, %c0_i32_0 : i32
    %c0_i32_1 = arith.constant 0 : i32
    return %2, %arg1 : i32, i32
  }
  func.func @transform_3(%arg0: i32, %arg1: i32, %arg2: i32) -> (i32, i32) {
    %c0_i32 = arith.constant 0 : i32
    return %arg0, %arg1 : i32, i32
  }
  func.func @transform_4(%arg0: i32, %arg1: i32, %arg2: i32) -> (i32, i32) {
    %c0_i32 = arith.constant 0 : i32
    return %arg0, %arg1 : i32, i32
  }
  func.func @transform_5(%arg0: i32, %arg1: i32, %arg2: i32) -> (i32, i32, i32) {
    %c0_i32 = arith.constant 0 : i32
    %c0_i32_0 = arith.constant 0 : i32
    return %arg0, %c0_i32, %arg1 : i32, i32, i32
  }
}

module attributes {stable_mosaic.version = 11 : i64} {
  func.func @_combine_kernel(%arg0: i32, %arg1: i32, %arg2: memref<32x128xf32, #tpu.memory_space<vmem>>, %arg3: memref<1x128xf32, #tpu.memory_space<vmem>>, %arg4: memref<1x128xf32, #tpu.memory_space<vmem>>, %arg5: memref<32x128xf32, #tpu.memory_space<vmem>>, %arg6: memref<1x128xf32, #tpu.memory_space<vmem>>, %arg7: memref<1x128xf32, #tpu.memory_space<vmem>>, %arg8: memref<32x128xf32, #tpu.memory_space<vmem>>) attributes {dimension_semantics = [#tpu.dimension_semantics<parallel>, #tpu.dimension_semantics<parallel>], iteration_bounds = array<i64: 2, 1>, scalar_prefetch = 0 : i64, scratch_operands = 0 : i64, tpu.core_type = #tpu.core_type<tc>, window_params = [{transform_indices = @transform_0, window_bounds = array<i64: 32, 128>}, {transform_indices = @transform_1, window_bounds = array<i64: 1, 128>}, {transform_indices = @transform_2, window_bounds = array<i64: 1, 128>}, {transform_indices = @transform_3, window_bounds = array<i64: 32, 128>}, {transform_indices = @transform_4, window_bounds = array<i64: 1, 128>}, {transform_indices = @transform_5, window_bounds = array<i64: 1, 128>}, {transform_indices = @transform_6, window_bounds = array<i64: 32, 128>}]} {
    %c0 = arith.constant 0 : index
    %c0_0 = arith.constant 0 : index
    %0 = vector.load %arg2[%c0, %c0_0] : memref<32x128xf32, #tpu.memory_space<vmem>>, vector<32x128xf32>
    %c0_1 = arith.constant 0 : index
    %c0_2 = arith.constant 0 : index
    %1 = vector.load %arg3[%c0_1, %c0_2] : memref<1x128xf32, #tpu.memory_space<vmem>>, vector<1x128xf32>
    %2 = vector.broadcast %1 : vector<1x128xf32> to vector<32x128xf32>
    %3 = arith.mulf %0, %2 : vector<32x128xf32>
    %c0_3 = arith.constant 0 : index
    %c0_4 = arith.constant 0 : index
    %4 = vector.load %arg4[%c0_3, %c0_4] : memref<1x128xf32, #tpu.memory_space<vmem>>, vector<1x128xf32>
    %5 = vector.broadcast %4 : vector<1x128xf32> to vector<32x128xf32>
    %6 = arith.addf %3, %5 : vector<32x128xf32>
    %c0_5 = arith.constant 0 : index
    %c0_6 = arith.constant 0 : index
    %7 = vector.load %arg5[%c0_5, %c0_6] : memref<32x128xf32, #tpu.memory_space<vmem>>, vector<32x128xf32>
    %c0_7 = arith.constant 0 : index
    %c0_8 = arith.constant 0 : index
    %8 = vector.load %arg6[%c0_7, %c0_8] : memref<1x128xf32, #tpu.memory_space<vmem>>, vector<1x128xf32>
    %9 = vector.broadcast %8 : vector<1x128xf32> to vector<32x128xf32>
    %10 = arith.mulf %7, %9 : vector<32x128xf32>
    %11 = arith.addf %6, %10 : vector<32x128xf32>
    %c0_9 = arith.constant 0 : index
    %c0_10 = arith.constant 0 : index
    %12 = vector.load %arg7[%c0_9, %c0_10] : memref<1x128xf32, #tpu.memory_space<vmem>>, vector<1x128xf32>
    %13 = vector.broadcast %12 : vector<1x128xf32> to vector<32x128xf32>
    %14 = arith.addf %11, %13 : vector<32x128xf32>
    %c0_11 = arith.constant 0 : index
    %c0_12 = arith.constant 0 : index
    %15 = vector.load %arg8[%c0_11, %c0_12] : memref<32x128xf32, #tpu.memory_space<vmem>>, vector<32x128xf32>
    tpu.vector_store %arg8[%c0_11, %c0_12], %14 {strides = array<i32>} : memref<32x128xf32, #tpu.memory_space<vmem>>, vector<32x128xf32>,
    return
  }
  func.func @transform_0(%arg0: i32, %arg1: i32) -> (i32, i32) {
    %c0_i32 = arith.constant 0 : i32
    return %arg0, %arg1 : i32, i32
  }
  func.func @transform_1(%arg0: i32, %arg1: i32) -> (i32, i32) {
    %c0_i32 = arith.constant 0 : i32
    %c0_i32_0 = arith.constant 0 : i32
    return %c0_i32, %arg1 : i32, i32
  }
  func.func @transform_2(%arg0: i32, %arg1: i32) -> (i32, i32) {
    %c0_i32 = arith.constant 0 : i32
    %c0_i32_0 = arith.constant 0 : i32
    return %c0_i32, %arg1 : i32, i32
  }
  func.func @transform_3(%arg0: i32, %arg1: i32) -> (i32, i32) {
    %c0_i32 = arith.constant 0 : i32
    return %arg0, %arg1 : i32, i32
  }
  func.func @transform_4(%arg0: i32, %arg1: i32) -> (i32, i32) {
    %c0_i32 = arith.constant 0 : i32
    %c0_i32_0 = arith.constant 0 : i32
    return %c0_i32, %arg1 : i32, i32
  }
  func.func @transform_5(%arg0: i32, %arg1: i32) -> (i32, i32) {
    %c0_i32 = arith.constant 0 : i32
    %c0_i32_0 = arith.constant 0 : i32
    return %c0_i32, %arg1 : i32, i32
  }
  func.func @transform_6(%arg0: i32, %arg1: i32) -> (i32, i32) {
    %c0_i32 = arith.constant 0 : i32
    return %arg0, %arg1 : i32, i32
  }
}

module attributes {stable_mosaic.version = 11 : i64} {
  func.func @kernel(%arg0: i32, %arg1: i32, %arg2: i32, %arg3: memref<32x128xf32, #tpu.memory_space<vmem>>, %arg4: memref<1x128xf32, #tpu.memory_space<vmem>>, %arg5: memref<1x128xf32, #tpu.memory_space<vmem>>, %arg6: memref<128x128xf32, #tpu.memory_space<vmem>>, %arg7: memref<32x128xf32, #tpu.memory_space<vmem>>, %arg8: memref<1x2x128xf32, #tpu.memory_space<vmem>>, %arg9: memref<32x128xf32, #tpu.memory_space<vmem>>) attributes {dimension_semantics = [#tpu.dimension_semantics<parallel>, #tpu.dimension_semantics<parallel>, #tpu.dimension_semantics<arbitrary>], iteration_bounds = array<i64: 2, 1, 1>, scalar_prefetch = 0 : i64, scratch_operands = 1 : i64, tpu.core_type = #tpu.core_type<tc>, window_params = [{transform_indices = @transform_0, window_bounds = array<i64: 32, 128>}, {transform_indices = @transform_1, window_bounds = array<i64: 1, 128>}, {transform_indices = @transform_2, window_bounds = array<i64: 1, 128>}, {transform_indices = @transform_3, window_bounds = array<i64: 128, 128>}, {transform_indices = @transform_4, window_bounds = array<i64: 32, 128>}, {transform_indices = @transform_5, window_bounds = array<i64: 1, 2, 128>}]} {
    %c0_i32 = arith.constant 0 : i32
    %0 = arith.cmpi eq, %arg2, %c0_i32 : i32
    %1 = arith.extui %0 : i1 to i32
    %c0_i32_0 = arith.constant 0 : i32
    %2 = arith.cmpi ne, %1, %c0_i32_0 : i32
    scf.if %2 {
      %cst_16 = arith.constant 0.000000e+00 : f32
      %23 = vector.broadcast %cst_16 : f32 to vector<32x128xf32>
      %c0_17 = arith.constant 0 : index
      %c0_18 = arith.constant 0 : index
      %24 = vector.load %arg9[%c0_17, %c0_18] : memref<32x128xf32, #tpu.memory_space<vmem>>, vector<32x128xf32>
      tpu.vector_store %arg9[%c0_17, %c0_18], %23 {strides = array<i32>} : memref<32x128xf32, #tpu.memory_space<vmem>>, vector<32x128xf32>,
    } else {
    }
    %c0 = arith.constant 0 : index
    %c0_1 = arith.constant 0 : index
    %3 = vector.load %arg3[%c0, %c0_1] : memref<32x128xf32, #tpu.memory_space<vmem>>, vector<32x128xf32>
    %c0_2 = arith.constant 0 : index
    %c0_3 = arith.constant 0 : index
    %4 = vector.load %arg4[%c0_2, %c0_3] : memref<1x128xf32, #tpu.memory_space<vmem>>, vector<1x128xf32>
    %5 = vector.broadcast %4 : vector<1x128xf32> to vector<32x128xf32>
    %6 = arith.mulf %3, %5 : vector<32x128xf32>
    %c0_4 = arith.constant 0 : index
    %c0_5 = arith.constant 0 : index
    %7 = vector.load %arg5[%c0_4, %c0_5] : memref<1x128xf32, #tpu.memory_space<vmem>>, vector<1x128xf32>
    %8 = vector.broadcast %7 : vector<1x128xf32> to vector<32x128xf32>
    %9 = arith.addf %6, %8 : vector<32x128xf32>
    %cst = arith.constant 0.000000e+00 : f32
    %10 = vector.broadcast %cst : f32 to vector<32x128xf32>
    %11 = arith.cmpf oge, %9, %10 : vector<32x128xf32>
    %cst_6 = arith.constant 2.000000e-01 : f32
    %12 = vector.broadcast %cst_6 : f32 to vector<32x128xf32>
    %13 = arith.mulf %12, %9 : vector<32x128xf32>
    %14 = arith.select %11, %9, %13 : vector<32x128xi1>, vector<32x128xf32>
    %c0_7 = arith.constant 0 : index
    %c0_8 = arith.constant 0 : index
    %15 = vector.load %arg9[%c0_7, %c0_8] : memref<32x128xf32, #tpu.memory_space<vmem>>, vector<32x128xf32>
    %c0_9 = arith.constant 0 : index
    %c0_10 = arith.constant 0 : index
    %16 = vector.load %arg6[%c0_9, %c0_10] : memref<128x128xf32, #tpu.memory_space<vmem>>, vector<128x128xf32>
    %cst_11 = arith.constant dense<0.000000e+00> : vector<32x128xf32>
    %17 = tpu.matmul %14, %16, %cst_11 {dimension_numbers = #tpu.dot_dimension_numbers<[1], [0], [0], [1], [0, 0, 1, 1], [], []>} : vector<32x128xf32>, vector<128x128xf32>, vector<32x128xf32> -> vector<32x128xf32>
    %18 = arith.addf %15, %17 : vector<32x128xf32>
    %c0_12 = arith.constant 0 : index
    %c0_13 = arith.constant 0 : index
    %19 = vector.load %arg9[%c0_12, %c0_13] : memref<32x128xf32, #tpu.memory_space<vmem>>, vector<32x128xf32>
    tpu.vector_store %arg9[%c0_12, %c0_13], %18 {strides = array<i32>} : memref<32x128xf32, #tpu.memory_space<vmem>>, vector<32x128xf32>,
    %c0_i32_14 = arith.constant 0 : i32
    %20 = arith.cmpi eq, %arg2, %c0_i32_14 : i32
    %21 = arith.extui %20 : i1 to i32
    %c0_i32_15 = arith.constant 0 : i32
    %22 = arith.cmpi ne, %21, %c0_i32_15 : i32
    scf.if %22 {
      %c0_16 = arith.constant 0 : index
      %c0_17 = arith.constant 0 : index
      %23 = vector.load %arg9[%c0_16, %c0_17] : memref<32x128xf32, #tpu.memory_space<vmem>>, vector<32x128xf32>
      %c0_18 = arith.constant 0 : index
      %c0_19 = arith.constant 0 : index
      %24 = vector.load %arg7[%c0_18, %c0_19] : memref<32x128xf32, #tpu.memory_space<vmem>>, vector<32x128xf32>
      tpu.vector_store %arg7[%c0_18, %c0_19], %23 {strides = array<i32>} : memref<32x128xf32, #tpu.memory_space<vmem>>, vector<32x128xf32>,
      %cst_20 = arith.constant dense<0.000000e+00> : vector<128xf32>
      %25 = vector.multi_reduction <add>, %23, %cst_20 [0] : vector<32x128xf32> to vector<128xf32>
      %26 = vector.shape_cast %25 : vector<128xf32> to vector<1x128xf32>
      %27 = arith.mulf %23, %23 : vector<32x128xf32>
      %cst_21 = arith.constant dense<0.000000e+00> : vector<128xf32>
      %28 = vector.multi_reduction <add>, %27, %cst_21 [0] : vector<32x128xf32> to vector<128xf32>
      %29 = vector.shape_cast %28 : vector<128xf32> to vector<1x128xf32>
      %30 = tpu.concatenate %26, %29 in 0 : vector<1x128xf32>, vector<1x128xf32> -> vector<2x128xf32>
      %c0_22 = arith.constant 0 : index
      %c0_23 = arith.constant 0 : index
      %c0_24 = arith.constant 0 : index
      %31 = vector.load %arg8[%c0_22, %c0_23, %c0_24] : memref<1x2x128xf32, #tpu.memory_space<vmem>>, vector<1x2x128xf32>
      %32 = vector.shape_cast %31 : vector<1x2x128xf32> to vector<2x128xf32>
      %33 = vector.shape_cast %30 : vector<2x128xf32> to vector<1x2x128xf32>
      tpu.vector_store %arg8[%c0_22, %c0_23, %c0_24], %33 {strides = array<i32>} : memref<1x2x128xf32, #tpu.memory_space<vmem>>, vector<1x2x128xf32>,
    } else {
    }
    return
  }
  func.func @transform_0(%arg0: i32, %arg1: i32, %arg2: i32) -> (i32, i32) {
    %c0_i32 = arith.constant 0 : i32
    return %arg0, %arg2 : i32, i32
  }
  func.func @transform_1(%arg0: i32, %arg1: i32, %arg2: i32) -> (i32, i32) {
    %c0_i32 = arith.constant 0 : i32
    %c0_i32_0 = arith.constant 0 : i32
    return %c0_i32, %arg2 : i32, i32
  }
  func.func @transform_2(%arg0: i32, %arg1: i32, %arg2: i32) -> (i32, i32) {
    %c0_i32 = arith.constant 0 : i32
    %c0_i32_0 = arith.constant 0 : i32
    return %c0_i32, %arg2 : i32, i32
  }
  func.func @transform_3(%arg0: i32, %arg1: i32, %arg2: i32) -> (i32, i32) {
    %c0_i32 = arith.constant 0 : i32
    return %arg2, %arg1 : i32, i32
  }
  func.func @transform_4(%arg0: i32, %arg1: i32, %arg2: i32) -> (i32, i32) {
    %c0_i32 = arith.constant 0 : i32
    return %arg0, %arg1 : i32, i32
  }
  func.func @transform_5(%arg0: i32, %arg1: i32, %arg2: i32) -> (i32, i32, i32) {
    %c0_i32 = arith.constant 0 : i32
    %c0_i32_0 = arith.constant 0 : i32
    return %arg0, %c0_i32, %arg1 : i32, i32, i32
  }
}

</mosaic_0001>

<bundles_post_ra>
// kernel: residual_conv_forward.9
= control target key start
LH: loop header
LB: loop body
LE: loop exit
PB: predicated region body
PF: predicated region fallthrough
CT: control target
= control target key end

     0   :  { %s2293_s0 = inlined_call_operand.hbm [shape: f32[64,384], index: 0, kind: input, shape index: {}]   ;;  %s2294_s1 = inlined_call_operand.hbm [shape: f32[384,128], index: 1, kind: input, shape index: {}]   ;;  %s2295_s2 = inlined_call_operand.hbm [shape: f32[128,128], index: 2, kind: input, shape index: {}]   ;;  %s2296_s3 = inlined_call_operand.hbm [shape: f32[64,128], index: 3, kind: output, shape index: {0}]   ;;  %s2297_s4 = inlined_call_operand.hbm [shape: f32[64,128], index: 4, kind: output, shape index: {1}]   ;;  %s2298_s5 = inlined_call_operand.hbm [shape: f32[2,4,128], index: 5, kind: output, shape index: {2}]  }
   0x1   :  { %2318 = sst [smem:[#allocation29_spill]] %s2294_s1 }
   0x2   :  { %2319 = sst [smem:[#allocation30_spill]] %s2298_s5 }
   0x3   :  { %11 = vsyncpa [#allocation5], 0 }
   0x4   :  { %13 = vsyncpa [#allocation5 + $0x1], 0 }
   0x5   :  { %14 = vsyncpa [#allocation8], 0 }
   0x6   :  { %16 = vsyncpa [#allocation8 + $0x1], 0 }
   0x7   :  { %17 = vsyncpa [#allocation6], 0 }
   0x8   :  { %19 = vsyncpa [#allocation6 + $0x1], 0 }
   0x9   :  { %20 = vsyncpa [#allocation12], 0 }
   0xa   :  { %22 = vsyncpa [#allocation12 + $0x1], 0  ;;  %s1753_s18 = smov 0   ;;  %s1755_s19 = smov 0  }
   0xb   :  { %s1757_s20 = smov 0   ;;  %s1759_s21 = smov 0  }
   0xc   :  { %s1761_s22 = smov 0   ;;  %s1763_s23 = smov 0  }
   0xd   :  { %s1765_s24 = smov 0   ;;  %s1767_s25 = smov 0  }
   0xe   :  { %s1769_s26 = smov 0   ;;  %s1771_s27 = smov 0  }
   0xf   :  { %s1773_s28 = smov 0   ;;  %s1775_s29 = smov 0  }
  0x10   :  { %s1777_s30 = smov 0   ;;  %s1779_s6 = smov 0  }
  0x11 LB: > { %2320 = sst [smem:[#allocation19_spill]] %s1657_s18  ;;  %s1824_s7 = sadd.s32 4294967295, %s1709_s6   ;;  %s1709_s6 = sphi %s1779_s6, %s28_s6   ;;  %s1705_s30 = sphi %s1777_s30, %s2372_s30   ;;  %s1701_s29 = sphi %s1775_s29, %s2371_s29   ;;  %s1697_s28 = sphi %s1773_s28, %s2370_s28   ;;  %s1693_s27 = sphi %s1771_s27, %s2381_s27   ;;  %s1689_s26 = sphi %s1769_s26, %s2380_s26   ;;  %s1685_s25 = sphi %s1767_s25, %s2379_s25   ;;  %s1681_s24 = sphi %s1765_s24, %s2378_s24   ;;  %s1677_s23 = sphi %s1763_s23, %s2377_s23   ;;  %s1673_s22 = sphi %s1761_s22, %s2376_s22   ;;  %s1669_s21 = sphi %s1759_s21, %s2375_s21   ;;  %s1665_s20 = sphi %s1757_s20, %s2366_s20   ;;  %s1661_s19 = sphi %s1755_s19, %s2374_s19   ;;  %s1657_s18 = sphi %s1753_s18, %s2373_s18  }
  0x12   : > { %2321 = sst [smem:[#allocation20_spill]] %s1665_s20  ;;  %s40_s9 = sadd.s32 1, %s1701_s29 }
  0x13   : > { %2322 = sst [smem:[#allocation21_spill]] %s1677_s23  ;;  %s47_s10 = sadd.s32 1, %s1705_s30 }
  0x14   : > { %2323 = sst [smem:[#allocation22_spill]] %s1701_s29  ;;  %p41_p0 = scmp.ge.s32.totalorder %s40_s9, 3 }
  0x15   : > { %2324 = sst [smem:[#allocation23_spill]] %s1705_s30  ;;  %p2307_p1 = scmp.eq.s32.totalorder %s1709_s6, 0 }
  0x16   : > { %p2305_p2 = scmp.eq.s32.totalorder %s1824_s7, 0  ;;  %s84_s11 = sadd.s32 1, %s1677_s23 }
  0x17   : > { %s2383_s9 = smov (%p41_p0, %s40_s9), 0  ;;  %s2385_s10 = smov (!%p41_p0, %s47_s10), %s1705_s30 }
  0x18   : > { %2325 = sst [smem:[#allocation24_spill]] %s2383_s9  ;;  %s52_s12 = ssub.s32 %s1701_s29, %s2383_s9 }
  0x19   : > { %p91_p3 = scmp.ne.s32.totalorder %s1677_s23, %s1673_s22  ;;  %p49_p4 = scmp.ge.s32.totalorder %s2385_s10, 2 }
  0x1a   : > { %p82_p5 = scmp.eq.s32.totalorder %s52_s12, 0  ;;  %p97_p7 = scmp.ne.s32.totalorder %s1673_s22, %s1669_s21 }
  0x1b   : > { %p1841_p6 = por %p91_p3, %p2307_p1  ;;  %s2387_s10 = smov (%p49_p4, %s2385_s10), 0 }
  0x1c   : > { %2327 = sst [smem:[#allocation25_spill]] %s2387_s10  ;;  %s51_s15 = ssub.s32 %s1705_s30, %s2387_s10 }
  0x1d   : > { %s1850_s14 = scalar_select %p82_p5, %s1677_s23, %s84_s11  }
  0x1e   : > { %p1856_p8 = por %p97_p7, %p2305_p2  ;;  %s53_s17 = sor.u32 %s52_s12, %s51_s15 }
  0x1f   : > { %2328 = sst [smem:[#allocation26_spill]] %s1850_s14  ;;  %p148_p9 = scmp.eq.s32.totalorder %s51_s15, 0 }
  0x20   : > { %s2329_s16 = scalar_select %p1856_p8, 1, 0 }
  0x21   : > { %p1860_p10 = scmp.eq.s32.totalorder %s53_s17, 0  ;;  %s150_s21 = sadd.s32 1, %s1665_s20 }
  0x22   : > { %s1866_s9 = scalar_select %p148_p9, %s1665_s20, %s150_s21  }
  0x23   : > { %p160_p11 = scmp.ne.s32.totalorder %s1665_s20, %s1661_s19  ;;  %p161_p12 = scmp.eq.s32.totalorder %s1824_s7, 5 }
  0x24   : > { %2331 = sst [smem:[#allocation27_spill]] %s1866_s9  ;;  %p166_p13 = scmp.ne.s32.totalorder %s1661_s19, %s1657_s18 }
  0x25   : > { %s2332_s11 = sadd.s32 4294967294, %s1709_s6   ;;  %p1875_p3 = por %p161_p12, %p160_p11 }
  0x26   : > { %p167_p0 = scmp.eq.s32.totalorder %s2332_s11, 5  ;;  %p2306_p5 = scmp.lt.s32.totalorder %s1709_s6, 6 }
  0x27   : > { %s2333_s10 = scalar_select %p1875_p3, 1, 0 }
  0x28   : > { %p1879_p4 = por %p167_p0, %p166_p13  ;;  %s266_s15 = sand.u32 1, %s1709_s6  }
  0x29   : > { %s268_s17 = sand.u32 1, %s1677_s23   ;;  %s1038_s14 = sshll.u32 %s1701_s29, 11 }
  0x2a   : > { %s2334_s12 = scalar_select %p1879_p4, 1, 0 }
  0x2b   : > { %s1007_s21 = sshll.u32 %s268_s17, 7  ;;  %s2336_s1 = sld [smem:[#allocation29_spill]] }
  0x2c   : > { %2335 = sst [smem:[#allocation28_spill]] %s2334_s12  ;;  %s270_s11 = scalar_lea.vmem [#allocation7], %s1007_s21 }
  0x2d   : > { %s278_s18 = sshll.u32 %s270_s11, 4  ;;  %p1898_p7 = pnand %p2306_p5, %p1841_p6  ;;  %s1892_s18 = int_to_ptr.vmem [resolvable:$true] %s278_s18 }
  0x2e   : > { %s1904_s20 = scalar_lea.sflag [#allocation8], %s266_s15 }
  0x2f   : > { %p1409_p13 = pneg %p1898_p7 }
  0x31   : > { %s1890_s5 = scalar_lea.hbm %s2336_s1, %s1038_s14  ;;  %s1412_s17 = scalar_lea.hbm %s2336_s1, 6144 }
  0x32   : > { %s1407_s9 = scalar_lea.hbm %s1890_s5, 2048  ;;  %p1413_p6 = scmp.lt.u32.totalorder %s1890_s5, %s2336_s1 }
  0x33   : > { %p1408_p12 = scmp.ne.s32.totalorder %s1890_s5, %s1407_s9  ;;  %p1414_p5 = scmp.lt.u32.totalorder %s1412_s17, %s1407_s9 }
  0x34   : > { %p1416_p9 = scmp.lt.u32.totalorder %s1407_s9, %s1890_s5 }
  0x35   : > { %p1410_p0 = pnand %p1409_p13, %p1408_p12  ;;  %p1415_p1 = por %p1414_p5, %p1413_p6 }
  0x37   : > { %p1411_p2 = pneg %p1410_p0  ;;  %p1417_p11 = por %p1416_p9, %p1415_p1 }
  0x39   : > { %p1418_p4 = pnand %p1417_p11, %p1411_p2 }
  0x3b   : > { %1421 = shalt.err (!%p1418_p4)
}
  0x3c   : > { %s1422_s15 = scalar_lea.vmem %s1892_s18, 2048  ;;  %s1711_s13 = smov [#allocation7]  }
  0x3d   : > { %p1423_p12 = scmp.ne.s32.totalorder %s1892_s18, %s1422_s15  ;;  %s1427_s14 = sshll.u32 %s1711_s13, 4  ;;  %s1428_s14 = int_to_ptr.vmem [resolvable:$false] %s1427_s14 }
  0x3e   : > { %s1429_s21 = scalar_lea.vmem %s1428_s14, 4096  ;;  %p1430_p8 = scmp.lt.s32.totalorder %s1892_s18, %s1428_s14 }
  0x3f   : > { %p1425_p0 = pnand %p1423_p12, %p1409_p13  ;;  %p1431_p5 = scmp.lt.s32.totalorder %s1429_s21, %s1422_s15 }
  0x41   : > { %p1426_p3 = pneg %p1425_p0  ;;  %p1432_p6 = por %p1431_p5, %p1430_p8 }
  0x43   : > { %p1433_p1 = pnand %p1432_p6, %p1426_p3 }
  0x45   : > { %1436 = shalt.err (!%p1433_p1)
}
  0x46   : > { %s2310_s9 = smov 128   ;;  %s2312_s17 = smov 8  }
  0x47   : > { %1272 = dma.hbm_to_vmem [thread:$0]  (!%p1898_p7), %s1890_s5, 2048, %s1892_s18, %s1904_s20, %s2310_s9, %s2310_s9, %s2312_s17  }
  0x48   : > { %p2338_p2 = scmp.lt.s32.totalorder %s1709_s6, 7  ;;  %p2339_p8 = scmp.ge.s32.totalorder %s1709_s6, 1 }
  0x49   : > { %s56_s15 = sadd.s32 1, %s1689_s26  ;;  %p63_p4 = scmp.ne.s32.totalorder %s1689_s26, %s1685_s25 }
  0x4a   : > { %p1939_p3 = pnand %p2339_p8, %p2338_p2  ;;  %p2341_p9 = scmp.eq.s32.totalorder %s1709_s6, 0 }
  0x4b   : > { %s1949_s13 = scalar_select %p1860_p10, %s1689_s26, %s56_s15  }
  0x4c   : > { %s2340_s11 = scalar_select %p1939_p3, 1, 0 }
  0x4d   : > { %p65_p11 = por %p2341_p9, %p63_p4  ;;  %p69_p13 = scmp.ne.s32.totalorder %s1685_s25, %s1681_s24 }
  0x4e   : > { %s243_s12 = sand.u32 1, %s1689_s26   ;;  %s1253_s14 = smul.u32 12, %s1705_s30 }
  0x4f   : > { %p2342_p12 = scmp.eq.s32.totalorder %s1824_s7, 0  ;;  %s1003_s18 = sshll.u32 %s243_s12, 5 }
  0x50   : > { %s253_s21 = sadd.s32 %s1701_s29, %s1253_s14  ;;  %s247_s8 = scalar_lea.vmem [#allocation4], %s1003_s18 }
  0x51   : > { %p1959_p0 = por %p2342_p12, %p69_p13  ;;  %s1006_s9 = sshll.u32 %s253_s21, 7 }
  0x52   : > { %s1967_s23 = scalar_lea.hbm %s2293_s0, %s1006_s9  ;;  %s256_s24 = sshll.u32 %s247_s8, 4  ;;  %s1969_s24 = int_to_ptr.vmem [resolvable:$true] %s256_s24 }
  0x53   : > { %s2343_s5 = scalar_select %p1959_p0, 1, 0 }
  0x54   : > { %p2344_p10 = scmp.lt.s32.totalorder %s1709_s6, 6  ;;  %s1714_s14 = smov [#allocation9]  }
  0x55   : > { %s1977_s21 = sshll.u32 %s1714_s14, 4  ;;  %s1979_s1 = scalar_lea.sflag [#allocation5], %s243_s12  ;;  %s306_s21 = int_to_ptr.vmem [resolvable:$true] %s1977_s21 }
  0x56   : > { %p1973_p7 = pnand %p2344_p10, %p65_p11  ;;  %s1437_s9 = scalar_lea.hbm %s1967_s23, 512 }
  0x57   : > { %p1438_p5 = scmp.ne.s32.totalorder %s1967_s23, %s1437_s9  ;;  %s1442_s8 = scalar_lea.hbm %s2293_s0, 3072 }
  0x58   : > { %p1439_p6 = pneg %p1973_p7  ;;  %p1443_p8 = scmp.lt.u32.totalorder %s1967_s23, %s2293_s0 }
  0x59   : > { %p1444_p4 = scmp.lt.u32.totalorder %s1442_s8, %s1437_s9  ;;  %p1446_p11 = scmp.lt.u32.totalorder %s1437_s9, %s1967_s23 }
  0x5a   : > { %p1440_p1 = pnand %p1439_p6, %p1438_p5 }
  0x5b   : > { %p1445_p9 = por %p1444_p4, %p1443_p8 }
  0x5c   : > { %p1441_p2 = pneg %p1440_p1 }
  0x5d   : > { %p1447_p13 = por %p1446_p11, %p1445_p9 }
  0x5f   : > { %p1448_p12 = pnand %p1447_p13, %p1441_p2 }
  0x61   : > { %1451 = shalt.err (!%p1448_p12)
}
  0x62   : > { %s1452_s12 = scalar_lea.vmem %s1969_s24, 512  ;;  %s1715_s14 = smov [#allocation4]  }
  0x63   : > { %p1453_p10 = scmp.ne.s32.totalorder %s1969_s24, %s1452_s12  ;;  %s1457_s17 = sshll.u32 %s1715_s14, 4  ;;  %s1458_s17 = int_to_ptr.vmem [resolvable:$false] %s1457_s17 }
  0x64   : > { %s1459_s29 = scalar_lea.vmem %s1458_s17, 1024  ;;  %p1460_p0 = scmp.lt.s32.totalorder %s1969_s24, %s1458_s17 }
  0x65   : > { %p1455_p5 = pnand %p1453_p10, %p1439_p6  ;;  %p1461_p8 = scmp.lt.s32.totalorder %s1459_s29, %s1452_s12 }
  0x67   : > { %p1456_p1 = pneg %p1455_p5  ;;  %p1462_p4 = por %p1461_p8, %p1460_p0 }
  0x69   : > { %p1463_p9 = pnand %p1462_p4, %p1456_p1 }
  0x6b   : > { %1466 = shalt.err (!%p1463_p9)
}
  0x6c   : > { %s1716_s30 = smov 384   ;;  %s2346_s9 = smov 8  }
  0x6d   : > { %s2347_s18 = smov 128   ;;  %p2348_p6 = scmp.eq.s32.totalorder %s1709_s6, 0 }
  0x6e   : > { %1269 = dma.hbm_to_vmem [thread:$0]  (!%p1973_p7), %s1967_s23, 512, %s1969_s24, %s1979_s1, %s1716_s30, %s2347_s18, %s2346_s9  }
  0x6f   : > { %p2349_p2 = scmp.lt.s32.totalorder %s1709_s6, 6  ;;  %s1467_s15 = scalar_lea.hbm %s2295_s2, 2048 }
  0x70   : > { %p1468_p0 = scmp.ne.s32.totalorder %s2295_s2, %s1467_s15  ;;  %p1474_p10 = scmp.lt.u32.totalorder %s1467_s15, %s2295_s2 }
  0x71   : > { %p2014_p11 = pnand %p2349_p2, %p2348_p6 }
  0x73   : > { %p1469_p13 = pneg %p2014_p11 }
  0x75   : > { %p1470_p12 = pnand %p1469_p13, %p1468_p0 }
  0x77   : > { %p1471_p7 = pneg %p1470_p12 }
  0x79   : > { %p1476_p5 = pnand %p1474_p10, %p1471_p7 }
  0x7b   : > { %1479 = shalt.err (!%p1476_p5)
}
  0x7c   : > { %s1480_s1 = scalar_lea.vmem %s306_s21, 2048  ;;  %s1487_s30 = scalar_lea.vmem %s306_s21, 4096 }
  0x7d   : > { %p1481_p1 = scmp.ne.s32.totalorder %s306_s21, %s1480_s1  ;;  %p1488_p9 = scmp.lt.s32.totalorder %s306_s21, %s306_s21 }
  0x7e   : > { %p1489_p6 = scmp.lt.s32.totalorder %s1487_s30, %s1480_s1 }
  0x7f   : > { %p1483_p8 = pnand %p1481_p1, %p1469_p13 }
  0x80   : > { %p1490_p2 = por %p1489_p6, %p1488_p9 }
  0x81   : > { %p1484_p4 = pneg %p1483_p8 }
  0x83   : > { %p1491_p3 = pnand %p1490_p2, %p1484_p4 }
  0x85   : > { %1494 = shalt.err (!%p1491_p3)
}
  0x86   : > { %1275 = dma.hbm_to_vmem [thread:$0]  (!%p2014_p11), %s2295_s2, 2048, %s306_s21, %s1904_s20, %s2347_s18, %s2347_s18, %s2346_s9  }
  0x87   : > { %p2351_p0 = scmp.ne.s32.totalorder %s2340_s11, 0 }
  0x88   : > { %s319_s15 = sand.u32 (!%p2351_p0), 1, %s1685_s25   ;;  %p2352_p3 = scmp.ne.s32.totalorder (!%p2351_p0), %s2343_s5, 0 }
  0x89   : > { %317 = sbr.rel (%p2351_p0) target bundleno = 731 (0x2db), region = 32  ;;  %s1020_s17 = sshll.u32 (!%p2351_p0), %s319_s15, 5 }
  0x8a   : > { %s320_s29 = scalar_lea.sflag (!%p2351_p0), [#allocation5], %s319_s15  ;;  %s2041_s23 = scalar_lea.vmem (!%p2351_p0), [#allocation4], %s1020_s17 }
  0x90   : > { %1636 = dma.done.wait (%p2352_p3), %s320_s29, 512  }
  0x91   : > { %1638 = vsyncadd (%p2352_p3), %s320_s29, 4294966784  ;;  %s328_s20 = sand.u32 1, %s1824_s7   ;;  %s330_s21 = sand.u32 1, %s1673_s22  }
  0x92   : > { %s1021_s11 = sshll.u32 %s330_s21, 7  ;;  %s329_s9 = scalar_lea.sflag [#allocation8], %s328_s20 }
  0x93   : > { %s2051_s18 = scalar_lea.vmem [#allocation7], %s1021_s11  ;;  %p2353_p11 = scmp.ne.s32.totalorder %s2329_s16, 0 }
  0x95   : > { %1640 = dma.done.wait (%p2353_p11), %s329_s9, 2048  }
  0x96   : > { %1642 = vsyncadd (%p2353_p11), %s329_s9, 4294965248  ;;  %p2354_p13 = scmp.eq.s32.totalorder %s1824_s7, 0 }
  0x98   : > { %1644 = dma.done.wait (%p2354_p13), %s329_s9, 2048   ;;  %p2355_p12 = pmov %p2354_p13 }
  0x99   : > { %s2062_s5 = sand.u32 1, %s1661_s19   ;;  %p1026_p7 = scmp.ne.s32.totalorder %s1693_s27, 0 }
  0x9a   : > { %1646 = vsyncadd (%p2355_p12), %s329_s9, 4294965248  ;;  %s1023_s8 = sshll.u32 %s2062_s5, 5  ;;  %s1025_s24 = sshll.u32 %s2062_s5, 2  ;;  %v1717_v0 = vmov (!%p1026_p7), 0.0  }
  0x9b   : > { %s2066_s1 = scalar_lea.vmem [#allocation10], %s1023_s8  ;;  %s2068_s30 = scalar_lea.vmem [#allocation11], %s1023_s8  ;;  %402 = vst [vmem:[#allocation2] sm:$0xff] (!%p1026_p7), %v1717_v0  ;;  %403 = vst [vmem:[#allocation2 + $0x8] sm:$0xff] (!%p1026_p7), %v1717_v0 }
  0x9c   : > { %s2070_s12 = scalar_lea.vmem [#allocation13], %s1025_s24  ;;  %401 = sbr.rel (%p1026_p7) target bundleno = 163 (0xa3), region = 48  ;;  %404 = vst [vmem:[#allocation2 + $0x10] sm:$0xff] (!%p1026_p7), %v1717_v0  ;;  %405 = vst [vmem:[#allocation2 + $0x18] sm:$0xff] (!%p1026_p7), %v1717_v0 }
  0x9d   : > { %406 = vst [vmem:[#allocation3] sm:$0xff] (!%p1026_p7), %v1717_v0  ;;  %407 = vst [vmem:[#allocation3 + $0x8] sm:$0xff] (!%p1026_p7), %v1717_v0 }
  0x9e   : > { %408 = vst [vmem:[#allocation3 + $0x10] sm:$0xff] (!%p1026_p7), %v1717_v0  ;;  %409 = vst [vmem:[#allocation3 + $0x18] sm:$0xff] (!%p1026_p7), %v1717_v0 }
  0xa3 PF: > { %v430_v1 = vld [vmem:[%s2051_s18] sm:$0xff]  ;;  %v431_v2 = vld [vmem:[%s2051_s18 + $0x8] sm:$0xff]  ;;  %v432_v3 = vld [vmem:[%s2051_s18 + $0x10] sm:$0xff]  ;;  %p539_p10 = scmp.ge.s32.totalorder %s1693_s27, 1  ;;  %p540_p5 = scmp.lt.s32.totalorder %s1693_s27, 2 }
  0xa4   : > { %v1157_v4 = vpack.c.bf16 %v431_v2, %v430_v1  ;;  %v433_v5 = vld [vmem:[%s2051_s18 + $0x18] sm:$0xff]  ;;  %v434_v7 = vld [vmem:[%s2051_s18 + $0x20] sm:$0xff]  ;;  %v435_v8 = vld [vmem:[%s2051_s18 + $0x28] sm:$0xff] }
  0xa5   : > { %v1161_v6 = vpack.c.bf16 %v433_v5, %v432_v3  ;;  %v1165_v9 = vpack.c.bf16 %v435_v8, %v434_v7  ;;  %v2080_v10 = vld [vmem:[%s2041_s23] sm:$0xff]  ;;  %v2083_v11 = vld [vmem:[%s2041_s23 + $0x10] sm:$0xff]  ;;  %v437_v13 = vld [vmem:[%s2051_s18 + $0x38] sm:$0xff]  ;;  %p2115_p1 = pnand %p540_p5, %p539_p10 }
  0xa6   : > { %1158 = vmatprep.subr.bf16.mxu0 %v1157_v4  ;;  %1221 = vmatprep.subr.bf16.mxu1 %v1157_v4  ;;  %v436_v12 = vld [vmem:[%s2051_s18 + $0x30] sm:$0xff]  ;;  %vm414_vm0 = vcmp.ge.f32.partialorder %v2080_v10, 0.0  ;;  %v418_v14 = vmul.f32 0.2, %v2080_v10  ;;  %vm416_vm1 = vcmp.ge.f32.partialorder %v2083_v11, 0.0  ;;  %v438_v19 = vld [vmem:[%s2051_s18 + $0x40] sm:$0xff] }
  0xa7   : > { %1160 = vmatpush3.bf16.msra.mxu0 %v1157_v4  ;;  %1229 = vmatpush3.bf16.msra.mxu1 %v1157_v4  ;;  %v420_v15 = vmul.f32 0.2, %v2083_v11  ;;  %v1169_v17 = vpack.c.bf16 %v437_v13, %v436_v12  ;;  %v439_v20 = vld [vmem:[%s2051_s18 + $0x48] sm:$0xff]  ;;  %v440_v22 = vld [vmem:[%s2051_s18 + $0x50] sm:$0xff]  ;;  %v441_v23 = vld [vmem:[%s2051_s18 + $0x58] sm:$0xff] }
  0xa8   : > { %1162 = vmatprep.subr.bf16.mxu0 %v1161_v6  ;;  %1222 = vmatprep.subr.bf16.mxu1 %v1161_v6  ;;  %v422_v16 = vsel %vm414_vm0, %v2080_v10, %v418_v14  ;;  %v1173_v21 = vpack.c.bf16 %v439_v20, %v438_v19  ;;  %v1177_v24 = vpack.c.bf16 %v441_v23, %v440_v22  ;;  %v442_v25 = vld [vmem:[%s2051_s18 + $0x60] sm:$0xff]  ;;  %v443_v26 = vld [vmem:[%s2051_s18 + $0x68] sm:$0xff]  ;;  %v444_v28 = vld [vmem:[%s2051_s18 + $0x70] sm:$0xff] }
  0xa9   : > { %v424_v18 = vsel %vm416_vm1, %v2083_v11, %v420_v15  ;;  %1113 = vmatprep.mubr.f32.mxu0 %v422_v16  ;;  %v1181_v27 = vpack.c.bf16 %v443_v26, %v442_v25  ;;  %v445_v29 = vld [vmem:[%s2051_s18 + $0x78] sm:$0xff]  ;;  %v2102_v31 = vld [vmem:[%s2041_s23 + $0x8] sm:$0xff]  ;;  %v426_v39 = vld [vmem:[#allocation2] sm:$0xff] }
  0xaa   : > { %1116 = vmatprep.mubr.f32.mxu1 %v424_v18  ;;  %v1185_v30 = vpack.c.bf16 %v445_v29, %v444_v28  ;;  %v2105_v32 = vld [vmem:[%s2041_s23 + $0x18] sm:$0xff]  ;;  %v419_v33 = vmul.f32 0.2, %v2102_v31  ;;  %vm415_vm2 = vcmp.ge.f32.partialorder %v2102_v31, 0.0  ;;  %v427_v37 = vld [vmem:[#allocation2 + $0x8] sm:$0xff]  ;;  %v428_v40 = vld [vmem:[#allocation2 + $0x10] sm:$0xff] }
  0xab   : > { %1164 = vmatpush3.bf16.msra.mxu0 %v1161_v6  ;;  %1230 = vmatpush3.bf16.msra.mxu1 %v1161_v6  ;;  %v421_v34 = vmul.f32 0.2, %v2105_v32  ;;  %vm417_vm3 = vcmp.ge.f32.partialorder %v2105_v32, 0.0  ;;  %v429_v38 = vld [vmem:[#allocation2 + $0x18] sm:$0xff]  ;;  %v549_v49 = vld [vmem:[#allocation9] sm:$0xff] (!%p2115_p1)  ;;  %v550_v50 = vld [vmem:[#allocation9 + $0x8] sm:$0xff] (!%p2115_p1) }
  0xac   : > { %1166 = vmatprep.subr.bf16.mxu0 %v1165_v9  ;;  %1223 = vmatprep.subr.bf16.mxu1 %v1165_v9  ;;  %v423_v35 = vsel %vm415_vm2, %v2102_v31, %v419_v33  ;;  %v551_v51 = vld [vmem:[#allocation9 + $0x10] sm:$0xff] (!%p2115_p1)  ;;  %v1189_v52 = vpack.c.bf16 (!%p2115_p1), %v550_v50, %v549_v49  ;;  %v552_v53 = vld [vmem:[#allocation9 + $0x18] sm:$0xff] (!%p2115_p1)  ;;  %v553_v55 = vld [vmem:[#allocation9 + $0x20] sm:$0xff] (!%p2115_p1) }
  0xad   : > { %v425_v36 = vsel %vm417_vm3, %v2105_v32, %v421_v34  ;;  %v1193_v54 = vpack.c.bf16 (!%p2115_p1), %v552_v53, %v551_v51  ;;  %v554_v56 = vld [vmem:[#allocation9 + $0x28] sm:$0xff] (!%p2115_p1)  ;;  %v555_v58 = vld [vmem:[#allocation9 + $0x30] sm:$0xff] (!%p2115_p1)  ;;  %v556_v59 = vld [vmem:[#allocation9 + $0x38] sm:$0xff] (!%p2115_p1) }
  0xae   : > { %v1197_v57 = vpack.c.bf16 (!%p2115_p1), %v554_v56, %v553_v55  ;;  %v1201_v60 = vpack.c.bf16 (!%p2115_p1), %v556_v59, %v555_v58  ;;  %v557_v61 = vld [vmem:[#allocation9 + $0x40] sm:$0xff] (!%p2115_p1)  ;;  %v558_v62 = vld [vmem:[#allocation9 + $0x48] sm:$0xff] (!%p2115_p1)  ;;  %v559_v0 = vld [vmem:[#allocation9 + $0x50] sm:$0xff] (!%p2115_p1) }
  0xaf   : > { %1168 = vmatpush3.bf16.msra.mxu0 %v1165_v9  ;;  %1231 = vmatpush3.bf16.msra.mxu1 %v1165_v9  ;;  %v1205_v63 = vpack.c.bf16 (!%p2115_p1), %v558_v62, %v557_v61  ;;  %v560_v1 = vld [vmem:[#allocation9 + $0x58] sm:$0xff] (!%p2115_p1)  ;;  %v561_v3 = vld [vmem:[#allocation9 + $0x60] sm:$0xff] (!%p2115_p1)  ;;  %v562_v4 = vld [vmem:[#allocation9 + $0x68] sm:$0xff] (!%p2115_p1) }
  0xb0   : > { %1170 = vmatprep.subr.bf16.mxu0 %v1169_v17  ;;  %1224 = vmatprep.subr.bf16.mxu1 %v1169_v17  ;;  %v1209_v2 = vpack.c.bf16 (!%p2115_p1), %v560_v1, %v559_v0  ;;  %v1213_v5 = vpack.c.bf16 (!%p2115_p1), %v562_v4, %v561_v3  ;;  %v563_v6 = vld [vmem:[#allocation9 + $0x70] sm:$0xff] (!%p2115_p1)  ;;  %v564_v7 = vld [vmem:[#allocation9 + $0x78] sm:$0xff] (!%p2115_p1)  ;;  %v546_v9 = vld [vmem:[#allocation3 + $0x8] sm:$0xff] (!%p2115_p1) }
  0xb1   : > { %v1217_v8 = vpack.c.bf16 (!%p2115_p1), %v564_v7, %v563_v6  ;;  %v547_v12 = vld [vmem:[#allocation3 + $0x10] sm:$0xff] (!%p2115_p1) }
  0xb3   : > { %1172 = vmatpush3.bf16.msra.mxu0 %v1169_v17  ;;  %1232 = vmatpush3.bf16.msra.mxu1 %v1169_v17 }
  0xb4   : > { %1174 = vmatprep.subr.bf16.mxu0 %v1173_v21  ;;  %1225 = vmatprep.subr.bf16.mxu1 %v1173_v21 }
  0xb7   : > { %1176 = vmatpush3.bf16.msra.mxu0 %v1173_v21  ;;  %1233 = vmatpush3.bf16.msra.mxu1 %v1173_v21 }
  0xb8   : > { %1178 = vmatprep.subr.bf16.mxu0 %v1177_v24  ;;  %1226 = vmatprep.subr.bf16.mxu1 %v1177_v24 }
  0xbb   : > { %1180 = vmatpush3.bf16.msra.mxu0 %v1177_v24  ;;  %1234 = vmatpush3.bf16.msra.mxu1 %v1177_v24 }
  0xbc   : > { %1182 = vmatprep.subr.bf16.mxu0 %v1181_v27  ;;  %1227 = vmatprep.subr.bf16.mxu1 %v1181_v27 }
  0xbf   : > { %1184 = vmatpush3.bf16.msra.mxu0 %v1181_v27  ;;  %1235 = vmatpush3.bf16.msra.mxu1 %v1181_v27 }
  0xc0   : > { %1186 = vmatprep.subr.bf16.mxu0 %v1185_v30  ;;  %1228 = vmatprep.subr.bf16.mxu1 %v1185_v30 }
  0xc3   : > { %1188 = vmatpush3.bf16.msra.mxu0 %v1185_v30  ;;  %1236 = vmatpush3.bf16.msra.mxu1 %v1185_v30 }
  0xc4   : > { %1190 = vmatprep.subr.bf16.mxu0 (!%p2115_p1), %v1189_v52  ;;  %1237 = vmatprep.subr.bf16.mxu1 (!%p2115_p1), %v1189_v52 }
  0xc6   : > { %1114 = vmatmul.mubr.f32.vlgmr.msra.gmra.mrb[0].mxu0 %v423_v35  ;;  %1117 = vmatmul.mubr.f32.vlgmr.msra.gmra.mrb[0].mxu1 %v425_v36 }
  0xc7   : > { %1151 = vmatprep.mubr.f32.mxu0 (!%p2115_p1), %v2080_v10  ;;  %1154 = vmatprep.mubr.f32.mxu1 (!%p2115_p1), %v2083_v11  ;;  %v548_v10 = vld [vmem:[#allocation3 + $0x18] sm:$0xff] (!%p2115_p1)  ;;  %v545_v11 = vld [vmem:[#allocation3] sm:$0xff] (!%p2115_p1) }
  0xc8   : > { %1192 = vmatpush3.bf16.msra.mxu0 (!%p2115_p1), %v1189_v52  ;;  %1245 = vmatpush3.bf16.msra.mxu1 (!%p2115_p1), %v1189_v52 }
  0xc9   : > { %1194 = vmatprep.subr.bf16.mxu0 (!%p2115_p1), %v1193_v54  ;;  %1238 = vmatprep.subr.bf16.mxu1 (!%p2115_p1), %v1193_v54 }
  0xcc   : > { %1196 = vmatpush3.bf16.msra.mxu0 (!%p2115_p1), %v1193_v54  ;;  %1246 = vmatpush3.bf16.msra.mxu1 (!%p2115_p1), %v1193_v54 }
  0xcd   : > { %1198 = vmatprep.subr.bf16.mxu0 (!%p2115_p1), %v1197_v57  ;;  %1239 = vmatprep.subr.bf16.mxu1 (!%p2115_p1), %v1197_v57 }
  0xd0   : > { %1200 = vmatpush3.bf16.msra.mxu0 (!%p2115_p1), %v1197_v57  ;;  %1247 = vmatpush3.bf16.msra.mxu1 (!%p2115_p1), %v1197_v57 }
  0xd1   : > { %1202 = vmatprep.subr.bf16.mxu0 (!%p2115_p1), %v1201_v60  ;;  %1240 = vmatprep.subr.bf16.mxu1 (!%p2115_p1), %v1201_v60 }
  0xd4   : > { %1204 = vmatpush3.bf16.msra.mxu0 (!%p2115_p1), %v1201_v60  ;;  %1248 = vmatpush3.bf16.msra.mxu1 (!%p2115_p1), %v1201_v60 }
  0xd5   : > { %1206 = vmatprep.subr.bf16.mxu0 (!%p2115_p1), %v1205_v63  ;;  %1241 = vmatprep.subr.bf16.mxu1 (!%p2115_p1), %v1205_v63 }
  0xd8   : > { %1208 = vmatpush3.bf16.msra.mxu0 (!%p2115_p1), %v1205_v63  ;;  %1249 = vmatpush3.bf16.msra.mxu1 (!%p2115_p1), %v1205_v63 }
  0xd9   : > { %1210 = vmatprep.subr.bf16.mxu0 (!%p2115_p1), %v1209_v2  ;;  %1242 = vmatprep.subr.bf16.mxu1 (!%p2115_p1), %v1209_v2 }
  0xdc   : > { %1212 = vmatpush3.bf16.msra.mxu0 (!%p2115_p1), %v1209_v2  ;;  %1250 = vmatpush3.bf16.msra.mxu1 (!%p2115_p1), %v1209_v2 }
  0xdd   : > { %1214 = vmatprep.subr.bf16.mxu0 (!%p2115_p1), %v1213_v5  ;;  %1243 = vmatprep.subr.bf16.mxu1 (!%p2115_p1), %v1213_v5 }
  0xe0   : > { %1216 = vmatpush3.bf16.msra.mxu0 (!%p2115_p1), %v1213_v5  ;;  %1251 = vmatpush3.bf16.msra.mxu1 (!%p2115_p1), %v1213_v5 }
  0xe1   : > { %1218 = vmatprep.subr.bf16.mxu0 (!%p2115_p1), %v1217_v8  ;;  %1244 = vmatprep.subr.bf16.mxu1 (!%p2115_p1), %v1217_v8 }
  0xe4   : > { %1220 = vmatpush3.bf16.msra.mxu0 (!%p2115_p1), %v1217_v8  ;;  %1252 = vmatpush3.bf16.msra.mxu1 (!%p2115_p1), %v1217_v8 }
 0x197   : > { %544 = sbr.rel (%p2115_p1) target bundleno = 626 (0x272), region = 52 }
 0x199   : > { %v1115_v41 = vpop.f32.mrb[0].mxu0  ;;  %v1118_v42 = vpop.f32.mrb[0].mxu1 }
 0x19a   : > { %v532_v43 = vadd.f32 %v1115_v41, %v427_v37  ;;  %v534_v44 = vadd.f32 %v1118_v42, %v429_v38  ;;  %v512_v45 = vpop.f32.mrb[1].mxu0  ;;  %v522_v46 = vpop.f32.mrb[1].mxu1  ;;  %1152 = vmatmul.mubr.f32.vlgmr.msra.gmra.mrb[0].mxu0 (!%p2115_p1), %v2102_v31  ;;  %1155 = vmatmul.mubr.f32.vlgmr.msra.gmra.mrb[0].mxu1 (!%p2115_p1), %v2105_v32 }
 0x19b   : > { %v531_v47 = vadd.f32 %v512_v45, %v426_v39  ;;  %v533_v48 = vadd.f32 %v522_v46, %v428_v40 }
 0x19c   : > { %536 = vst [vmem:[#allocation2 + $0x8] sm:$0xff] %v532_v43  ;;  %538 = vst [vmem:[#allocation2 + $0x18] sm:$0xff] %v534_v44 }
 0x19d   : > { %535 = vst [vmem:[#allocation2] sm:$0xff] %v531_v47  ;;  %537 = vst [vmem:[#allocation2 + $0x10] sm:$0xff] %v533_v48 }
 0x26d   : > { %v1153_v13 = vpop.f32.mrb[0].mxu0  ;;  %v1156_v14 = vpop.f32.mrb[0].mxu1 }
 0x26e   : > { %v651_v15 = vadd.f32 %v1153_v13, %v546_v9  ;;  %v653_v16 = vadd.f32 %v1156_v14, %v548_v10  ;;  %v631_v17 = vpop.f32.mrb[1].mxu0  ;;  %v641_v18 = vpop.f32.mrb[1].mxu1 }
 0x26f   : > { %v650_v19 = vadd.f32 %v631_v17, %v545_v11  ;;  %v652_v20 = vadd.f32 %v641_v18, %v547_v12 }
 0x270   : > { %655 = vst [vmem:[#allocation3 + $0x8] sm:$0xff] %v651_v15  ;;  %657 = vst [vmem:[#allocation3 + $0x18] sm:$0xff] %v653_v16 }
 0x271   : > { %654 = vst [vmem:[#allocation3] sm:$0xff] %v650_v19  ;;  %656 = vst [vmem:[#allocation3 + $0x10] sm:$0xff] %v652_v20 }
 0x272 PF: > { %p1027_p8 = scmp.ne.s32.totalorder %s1693_s27, 2 }
 0x273   : > { %vm722_vm4 = vcmask (!%p1027_p8), 1040384   ;;  %vm724_vm5 = vcmask (!%p1027_p8), 1041408   ;;  %vm726_vm6 = vcmask (!%p1027_p8), 1042432  }
 0x274   : > { %661 = sbr.rel (%p1027_p8) target bundleno = 657 (0x291), region = 56 }
 0x277   : > { %v663_v22 = vld [vmem:[#allocation2 + $0x8] sm:$0xff] (!%p1027_p8)  ;;  %v665_v28 = vld [vmem:[#allocation2 + $0x18] sm:$0xff] (!%p1027_p8) }
 0x278   : > { %v662_v21 = vld [vmem:[#allocation2] sm:$0xff] (!%p1027_p8)  ;;  %v664_v23 = vld [vmem:[#allocation2 + $0x10] sm:$0xff] (!%p1027_p8)  ;;  %671 = vst [vmem:[%s2066_s1 + $0x8] sm:$0xff] (!%p1027_p8), %v663_v22  ;;  %v688_v26 = vmul.f32 (!%p1027_p8), %v663_v22, %v663_v22  ;;  %v667_v30 = vld [vmem:[#allocation3 + $0x8] sm:$0xff] (!%p1027_p8)  ;;  %v690_v38 = vmul.f32 (!%p1027_p8), %v665_v28, %v665_v28 }
 0x279   : > { %670 = vst [vmem:[%s2066_s1] sm:$0xff] (!%p1027_p8), %v662_v21  ;;  %v687_v24 = vmul.f32 (!%p1027_p8), %v662_v21, %v662_v21  ;;  %v678_v25 = vadd.f32 (!%p1027_p8), %v663_v22, %v662_v21  ;;  %672 = vst [vmem:[%s2066_s1 + $0x10] sm:$0xff] (!%p1027_p8), %v664_v23  ;;  %v689_v27 = vmul.f32 (!%p1027_p8), %v664_v23, %v664_v23  ;;  %v666_v29 = vld [vmem:[#allocation3] sm:$0xff] (!%p1027_p8)  ;;  %v668_v34 = vld [vmem:[#allocation3 + $0x10] sm:$0xff] (!%p1027_p8) }
 0x27a   : > { %673 = vst [vmem:[%s2066_s1 + $0x18] sm:$0xff] (!%p1027_p8), %v665_v28  ;;  %674 = vst [vmem:[%s2068_s30] sm:$0xff] (!%p1027_p8), %v666_v29  ;;  %v709_v31 = vmul.f32 (!%p1027_p8), %v666_v29, %v666_v29  ;;  %v700_v32 = vadd.f32 (!%p1027_p8), %v667_v30, %v666_v29  ;;  %v710_v33 = vmul.f32 (!%p1027_p8), %v667_v30, %v667_v30  ;;  %v669_v35 = vld [vmem:[#allocation3 + $0x18] sm:$0xff] (!%p1027_p8) }
 0x27b   : > { %675 = vst [vmem:[%s2068_s30 + $0x8] sm:$0xff] %v667_v30  ;;  %v691_v36 = vadd.f32 %v688_v26, %v687_v24  ;;  %v679_v37 = vadd.f32 %v678_v25, %v664_v23  ;;  %676 = vst [vmem:[%s2068_s30 + $0x10] sm:$0xff] %v668_v34  ;;  %v711_v39 = vmul.f32 %v668_v34, %v668_v34 }
 0x27c   : > { %677 = vst [vmem:[%s2068_s30 + $0x18] sm:$0xff] %v669_v35  ;;  %v713_v40 = vadd.f32 %v710_v33, %v709_v31  ;;  %v701_v41 = vadd.f32 %v700_v32, %v668_v34  ;;  %v712_v42 = vmul.f32 %v669_v35, %v669_v35 }
 0x27d   : > { %v692_v43 = vadd.f32 %v691_v36, %v689_v27  ;;  %v680_v44 = vadd.f32 %v679_v37, %v665_v28 }
 0x27e   : > { %v714_v45 = vadd.f32 %v713_v40, %v711_v39  ;;  %v702_v46 = vadd.f32 %v701_v41, %v669_v35 }
 0x27f   : > { %v681_v47 = vrot.slane %v680_v44, 4  ;;  %v693_v48 = vadd.f32 %v692_v43, %v690_v38 }
 0x280   : > { %v703_v49 = vrot.slane %v702_v46, 4  ;;  %v715_v50 = vadd.f32 %v714_v45, %v712_v42 }
 0x281   : > { %v682_v51 = vadd.f32 %v681_v47, %v680_v44  ;;  %v694_v52 = vrot.slane %v693_v48, 4 }
 0x282   : > { %v704_v53 = vadd.f32 %v703_v49, %v702_v46  ;;  %v716_v54 = vrot.slane %v715_v50, 4 }
 0x283   : > { %v683_v55 = vrot.slane %v682_v51, 2  ;;  %v695_v56 = vadd.f32 %v694_v52, %v693_v48 }
 0x284   : > { %v705_v57 = vrot.slane %v704_v53, 2  ;;  %v717_v58 = vadd.f32 %v716_v54, %v715_v50 }
 0x285   : > { %v684_v59 = vadd.f32 %v683_v55, %v682_v51  ;;  %v696_v60 = vrot.slane %v695_v56, 2 }
 0x286   : > { %v706_v61 = vadd.f32 %v705_v57, %v704_v53  ;;  %v718_v62 = vrot.slane %v717_v58, 2 }
 0x287   : > { %v685_v63 = vrot.slane %v684_v59, 1  ;;  %v697_v0 = vadd.f32 %v696_v60, %v695_v56 }
 0x288   : > { %v707_v1 = vrot.slane %v706_v61, 1  ;;  %v719_v2 = vadd.f32 %v718_v62, %v717_v58 }
 0x289   : > { %v686_v3 = vadd.f32 %v685_v63, %v684_v59  ;;  %v698_v4 = vrot.slane %v697_v0, 1 }
 0x28a   : > { %v708_v5 = vadd.f32 %v707_v1, %v706_v61  ;;  %v720_v6 = vrot.slane %v719_v2, 1 }
 0x28b   : > { %v699_v7 = vadd.f32 %v698_v4, %v697_v0 }
 0x28c   : > { %v721_v8 = vadd.f32 %v720_v6, %v719_v2 }
 0x28d   : > { %v723_v9 = vsel %vm722_vm4, %v686_v3, %v699_v7 }
 0x28e   : > { %v725_v10 = vsel %vm724_vm5, %v723_v9, %v708_v5 }
 0x28f   : > { %v727_v11 = vsel %vm726_vm6, %v725_v10, %v721_v8 }
 0x290   : > { %728 = vst [vmem:[%s2070_s12] sm:$0xf] %v727_v11 }
 0x291 PF: > { %s1039_s27 = sshll.u32 %s1697_s28, 9  ;;  %s771_s29 = sshll.u32 %s2068_s30, 4  ;;  %s2144_s29 = int_to_ptr.vmem [resolvable:$true] %s771_s29 }
 0x292   : > { %s2141_s17 = scalar_lea.hbm %s2297_s4, %s1039_s27  ;;  %s2148_s23 = scalar_lea.sflag [#allocation12], %s328_s20 }
 0x293   : > { %s1495_s21 = scalar_lea.vmem %s2144_s29, 512  ;;  %p2357_p9 = scmp.ne.s32.totalorder %s2333_s10, 0 }
 0x294   : > { %p1496_p4 = scmp.ne.s32.totalorder %s2144_s29, %s1495_s21  ;;  %s1718_s11 = smov [#allocation11]  }
 0x295   : > { %s1499_s9 = sshll.u32 %s1718_s11, 4  ;;  %s1500_s9 = int_to_ptr.vmem [resolvable:$false] %s1499_s9 }
 0x296   : > { %p1497_p6 = pnand %p1496_p4, %p2357_p9  ;;  %s1501_s18 = scalar_lea.vmem %s1500_s9, 1024 }
 0x297   : > { %p1502_p0 = scmp.lt.s32.totalorder %s2144_s29, %s1500_s9  ;;  %p1503_p3 = scmp.lt.s32.totalorder %s1501_s18, %s1495_s21 }
 0x298   : > { %p1498_p2 = pneg %p1497_p6 }
 0x299   : > { %p1504_p11 = por %p1503_p3, %p1502_p0 }
 0x29b   : > { %p1505_p13 = pnand %p1504_p11, %p1498_p2 }
 0x29d   : > { %1508 = shalt.err (!%p1505_p13)
}
 0x29e   : > { %s1509_s7 = scalar_lea.hbm %s2141_s17, 512  ;;  %s1513_s24 = scalar_lea.hbm %s2297_s4, 1024 }
 0x29f   : > { %p1510_p12 = scmp.ne.s32.totalorder %s2141_s17, %s1509_s7  ;;  %p1514_p5 = scmp.lt.u32.totalorder %s2141_s17, %s2297_s4 }
 0x2a0   : > { %p1515_p1 = scmp.lt.u32.totalorder %s1513_s24, %s1509_s7  ;;  %p1517_p4 = scmp.lt.u32.totalorder %s1509_s7, %s2141_s17 }
 0x2a1   : > { %p1511_p7 = pnand %p1510_p12, %p2357_p9 }
 0x2a2   : > { %p1516_p8 = por %p1515_p1, %p1514_p5 }
 0x2a3   : > { %p1512_p10 = pneg %p1511_p7 }
 0x2a4   : > { %p1518_p6 = por %p1517_p4, %p1516_p8 }
 0x2a6   : > { %p1519_p2 = pnand %p1518_p6, %p1512_p10 }
 0x2a8   : > { %1522 = shalt.err (!%p1519_p2)
}
 0x2a9   : > { %s1719_s14 = smov 128   ;;  %s1720_s15 = smov 8  }
 0x2aa   : > { %1261 = dma.vmem_to_hbm [thread:$0]  (%p2357_p9), %s2144_s29, 512, %s2141_s17, %s2148_s23, %s1719_s14, %s1719_s14, %s1720_s15  }
 0x2ab   : > { %s2180_s9 = scalar_lea.hbm %s2296_s3, %s1039_s27  ;;  %s754_s18 = sshll.u32 %s2066_s1, 4  ;;  %s2183_s18 = int_to_ptr.vmem [resolvable:$true] %s754_s18 }
 0x2ac   : > { %s1035_s7 = sshll.u32 %s1697_s28, 6  ;;  %s730_s20 = scalar_lea.sflag [#allocation6], %s2062_s5 }
 0x2ad   : > { %s1523_s8 = scalar_lea.vmem %s2183_s18, 512  ;;  %s1721_s17 = smov [#allocation10]  }
 0x2ae   : > { %p1524_p0 = scmp.ne.s32.totalorder %s2183_s18, %s1523_s8  ;;  %s1527_s29 = sshll.u32 %s1721_s17, 4  ;;  %s1528_s29 = int_to_ptr.vmem [resolvable:$false] %s1527_s29 }
 0x2af   : > { %s1529_s24 = scalar_lea.vmem %s1528_s29, 1024  ;;  %p1530_p13 = scmp.lt.s32.totalorder %s2183_s18, %s1528_s29 }
 0x2b0   : > { %p1525_p3 = pnand %p1524_p0, %p2357_p9  ;;  %p1531_p12 = scmp.lt.s32.totalorder %s1529_s24, %s1523_s8 }
 0x2b2   : > { %p1526_p11 = pneg %p1525_p3  ;;  %p1532_p7 = por %p1531_p12, %p1530_p13 }
 0x2b4   : > { %p1533_p10 = pnand %p1532_p7, %p1526_p11 }
 0x2b6   : > { %1536 = shalt.err (!%p1533_p10)
}
 0x2b7   : > { %s1537_s1 = scalar_lea.hbm %s2180_s9, 512  ;;  %s1541_s16 = scalar_lea.hbm %s2296_s3, 1024 }
 0x2b8   : > { %p1538_p5 = scmp.ne.s32.totalorder %s2180_s9, %s1537_s1  ;;  %p1542_p4 = scmp.lt.u32.totalorder %s2180_s9, %s2296_s3 }
 0x2b9   : > { %p1543_p6 = scmp.lt.u32.totalorder %s1541_s16, %s1537_s1  ;;  %p1545_p0 = scmp.lt.u32.totalorder %s1537_s1, %s2180_s9 }
 0x2ba   : > { %p1539_p1 = pnand %p1538_p5, %p2357_p9 }
 0x2bb   : > { %p1544_p2 = por %p1543_p6, %p1542_p4 }
 0x2bc   : > { %p1540_p8 = pneg %p1539_p1 }
 0x2bd   : > { %p1546_p3 = por %p1545_p0, %p1544_p2 }
 0x2bf   : > { %p1547_p11 = pnand %p1546_p3, %p1540_p8 }
 0x2c1   : > { %1550 = shalt.err (!%p1547_p11)
}
 0x2c2   : > { %1260 = dma.vmem_to_hbm [thread:$0]  (%p2357_p9), %s2183_s18, 512, %s2180_s9, %s730_s20, %s1719_s14, %s1719_s14, %s1720_s15  }
 0x2c3   : > { %s2358_s29 = sld [smem:[#allocation30_spill]]  ;;  %s788_s27 = sshll.u32 %s2070_s12, 4  ;;  %s789_s27 = int_to_ptr.vmem [resolvable:$true] %s788_s27 }
 0x2c4   : > { %s1551_s30 = scalar_lea.vmem %s789_s27, 64  ;;  %s1722_s5 = smov [#allocation13]  }
 0x2c5   : > { %p1552_p13 = scmp.ne.s32.totalorder %s789_s27, %s1551_s30  ;;  %s1555_s16 = sshll.u32 %s1722_s5, 4  ;;  %s1556_s16 = int_to_ptr.vmem [resolvable:$false] %s1555_s16 }
 0x2c6   : > { %s1557_s21 = scalar_lea.vmem %s1556_s16, 128  ;;  %p1558_p10 = scmp.lt.s32.totalorder %s789_s27, %s1556_s16 }
 0x2c7   : > { %p1553_p12 = pnand %p1552_p13, %p2357_p9  ;;  %p1559_p5 = scmp.lt.s32.totalorder %s1557_s21, %s1551_s30 }
 0x2c9   : > { %s2359_s1 = smov %s2358_s29  ;;  %s2218_s24 = scalar_lea.hbm %s2358_s29, %s1035_s7 }
 0x2ca   : > { %p1554_p7 = pneg %p1553_p12  ;;  %p1560_p1 = por %p1559_p5, %p1558_p10 }
 0x2cc   : > { %p1561_p8 = pnand %p1560_p1, %p1554_p7 }
 0x2ce   : > { %1564 = shalt.err (!%p1561_p8)
}
 0x2cf   : > { %s1565_s28 = scalar_lea.hbm %s2218_s24, 64  ;;  %s1569_s15 = scalar_lea.hbm %s2359_s1, 128 }
 0x2d0   : > { %p1566_p4 = scmp.ne.s32.totalorder %s2218_s24, %s1565_s28  ;;  %p1570_p0 = scmp.lt.u32.totalorder %s2218_s24, %s2359_s1 }
 0x2d1   : > { %p1571_p3 = scmp.lt.u32.totalorder %s1569_s15, %s1565_s28  ;;  %p1573_p13 = scmp.lt.u32.totalorder %s1565_s28, %s2218_s24 }
 0x2d2   : > { %p1567_p6 = pnand %p1566_p4, %p2357_p9 }
 0x2d3   : > { %p1572_p11 = por %p1571_p3, %p1570_p0 }
 0x2d4   : > { %p1568_p2 = pneg %p1567_p6 }
 0x2d5   : > { %p1574_p12 = por %p1573_p13, %p1572_p11 }
 0x2d7   : > { %p1575_p7 = pnand %p1574_p12, %p1568_p2 }
 0x2d9   : > { %1578 = shalt.err (!%p1575_p7)
}
 0x2da   : > { %1262 = dma.vmem_to_hbm [thread:$0]  (%p2357_p9), %s789_s27, 64, %s2218_s24, %s2148_s23  }
 0x2db PF: > { %s2360_s7 = sld [smem:[#allocation19_spill]]  ;;  %s2361_s20 = sld [smem:[#allocation28_spill]] }
 0x2dc   : > { %p1287_p10 = scmp.ge.s32.totalorder %s1709_s6, 2 }
 0x2e1   : > { %s800_s11 = sand.u32 1, %s2360_s7   ;;  %p2362_p5 = scmp.ne.s32.totalorder %s2361_s20, 0 }
 0x2e2   : > { %s801_s8 = scalar_lea.sflag [#allocation6], %s800_s11 }
 0x2e3   : > { %p1277_p1 = pnand %p1287_p10, %p2362_p5 }
 0x2e5   : > { %1648 = dma.done.wait (!%p1277_p1), %s801_s8, 512  }
 0x2e6   : > { %1650 = vsyncadd (!%p1277_p1), %s801_s8, 4294966784  ;;  %s2363_s17 = sadd.s32 4294967294, %s1709_s6  }
 0x2e7   : > { %s809_s29 = sand.u32 1, %s2363_s17  }
 0x2e8   : > { %s810_s30 = scalar_lea.sflag [#allocation12], %s809_s29 }
 0x2e9   : > { %1652 = dma.done.wait (!%p1277_p1), %s810_s30, 576  }
 0x2ea   : > { %1654 = vsyncadd (!%p1277_p1), %s810_s30, 4294966720  ;;  %s28_s6 = sadd.s32 1, %s1709_s6   ;;  %s2365_s23 = sld [smem:[#allocation20_spill]] }
 0x2eb   : > { %p2246_p9 = scmp.ge.s32.totalorder %s28_s6, 8   ;;  %s2366_s20 = sld [smem:[#allocation27_spill]] }
 0x2ec   : > { %s2367_s24 = sld [smem:[#allocation21_spill]]  ;;  %s2368_s27 = sld [smem:[#allocation26_spill]] }
 0x2ed   : > { %s2369_s5 = sld [smem:[#allocation22_spill]]  ;;  %s2370_s28 = sld [smem:[#allocation23_spill]] }
 0x2ee   : > { %s2371_s29 = sld [smem:[#allocation24_spill]]  ;;  %s2372_s30 = sld [smem:[#allocation25_spill]] }
 0x2ef   : > { %s2373_s18 = smov %s1661_s19  ;;  %s2375_s21 = smov %s1673_s22 }
 0x2f0   : > { %s2374_s19 = smov %s2365_s23  ;;  %27 = sbr.rel (!%p2246_p9) target bundleno = 17 (0x11), region = 145 }
 0x2f2   : > { %s2376_s22 = smov %s2367_s24  ;;  %s2377_s23 = smov %s2368_s27 }
 0x2f3   : > { %s2378_s24 = smov %s1685_s25  ;;  %s2379_s25 = smov %s1689_s26 }
 0x2f4   : > { %s2380_s26 = smov %s1949_s13  ;;  %s2381_s27 = smov %s2369_s5 }
 0x2f7   :  { %824 = vsyncpa [#allocation5], 1 }
 0x2f8   :  { %826 = vsyncpa [#allocation5 + $0x1], 1 }
 0x2f9   :  { %827 = vsyncpa [#allocation8], 1 }
 0x2fa   :  { %829 = vsyncpa [#allocation8 + $0x1], 1 }
 0x2fb   :  { %830 = vsyncpa [#allocation6], 1 }
 0x2fc   :  { %832 = vsyncpa [#allocation6 + $0x1], 1 }
 0x2fd   :  { %833 = vsyncpa [#allocation12], 1 }
 0x2fe   :  { %835 = vsyncpa [#allocation12 + $0x1], 1 }

// kernel: residual_conv_forward.11
= control target key start
LH: loop header
LB: loop body
LE: loop exit
PB: predicated region body
PF: predicated region fallthrough
CT: control target
= control target key end

     0   :  { %s1461_s0 = inlined_call_operand.hbm [shape: f32[64,128], index: 0, kind: input, shape index: {}]   ;;  %s1462_s1 = inlined_call_operand.hbm [shape: f32[1,128], index: 1, kind: input, shape index: {}]   ;;  %s1463_s2 = inlined_call_operand.hbm [shape: f32[1,128], index: 2, kind: input, shape index: {}]   ;;  %s1464_s3 = inlined_call_operand.hbm [shape: f32[64,128], index: 3, kind: input, shape index: {}]   ;;  %s1465_s4 = inlined_call_operand.hbm [shape: f32[1,128], index: 4, kind: input, shape index: {}]   ;;  %s1466_s5 = inlined_call_operand.hbm [shape: f32[1,128], index: 5, kind: input, shape index: {}]   ;;  %s1467_s6 = inlined_call_operand.hbm [shape: f32[64,128], index: 6, kind: output, shape index: {}]  }
   0x1   :  { %1472 = sst [smem:[#allocation20_spill]] %s1461_s0 }
   0x2   :  { %1473 = sst [smem:[#allocation21_spill]] %s1462_s1 }
   0x3   :  { %1474 = sst [smem:[#allocation22_spill]] %s1463_s2 }
   0x4   :  { %1475 = sst [smem:[#allocation23_spill]] %s1465_s4 }
   0x5   :  { %1476 = sst [smem:[#allocation24_spill]] %s1466_s5 }
   0x6   :  { %11 = vsyncpa [#allocation3], 0 }
   0x7   :  { %13 = vsyncpa [#allocation3 + $0x1], 0 }
   0x8   :  { %14 = vsyncpa [#allocation6], 0 }
   0x9   :  { %15 = vsyncpa [#allocation9], 0 }
   0xa   :  { %17 = vsyncpa [#allocation9 + $0x1], 0 }
   0xb   :  { %18 = vsyncpa [#allocation12], 0 }
   0xc   :  { %19 = vsyncpa [#allocation4], 0 }
   0xd   :  { %21 = vsyncpa [#allocation4 + $0x1], 0  ;;  %s1106_s21 = smov 0   ;;  %s1108_s22 = smov 0  }
   0xe   :  { %s1110_s23 = smov 0   ;;  %s1112_s24 = smov 0  }
   0xf   :  { %s1114_s25 = smov 0   ;;  %s1116_s26 = smov 0  }
  0x10 LB: > { %s1137_s27 = sadd.s32 4294967295, %s1058_s26   ;;  %s643_s28 = sadd.s32 4294967294, %s1058_s26   ;;  %s1058_s26 = sphi %s1116_s26, %s27_s26   ;;  %s1054_s25 = sphi %s1114_s25, %s1505_s25   ;;  %s1050_s24 = sphi %s1112_s24, %s1504_s24   ;;  %s1046_s23 = sphi %s1110_s23, %s1503_s23   ;;  %s1042_s22 = sphi %s1108_s22, %s1502_s22   ;;  %s1038_s21 = sphi %s1106_s21, %s1501_s21  }
  0x11   : > { %p61_p0 = scmp.ne.s32.totalorder %s1042_s22, %s1038_s21  ;;  %p1468_p1 = scmp.eq.s32.totalorder %s1137_s27, 0 }
  0x12   : > { %p225_p3 = scmp.eq.s32.totalorder %s643_s28, 1  ;;  %p644_p5 = scmp.ge.s32.totalorder %s1058_s26, 1 }
  0x13   : > { %p1146_p4 = por %p1468_p1, %p61_p0  ;;  %p232_p7 = scmp.lt.s32.totalorder %s1058_s26, 3 }
  0x14   : > { %p1151_p6 = por %p225_p3, %p61_p0  ;;  %s1060_s8 = smov [#allocation5]  }
  0x15   : > { %s1477_s29 = scalar_select %p1146_p4, 1, 0 }
  0x16   : > { %s1478_s30 = scalar_select %p1151_p6, 1, 0 }
  0x17   : > { %p1156_p8 = pnand %p644_p5, %p232_p7  ;;  %s247_s9 = sshll.u32 %s1060_s8, 4  ;;  %s248_s9 = int_to_ptr.vmem [resolvable:$true] %s247_s9 }
  0x18   : > { %s1061_s10 = smov [#allocation10]   ;;  %s1062_s13 = smov [#allocation7]  }
  0x19   : > { %s1479_s7 = scalar_select %p1156_p8, 1, 0 }
  0x1a   : > { %p698_p10 = pneg %p1156_p8  ;;  %s273_s11 = sshll.u32 %s1061_s10, 4  ;;  %s1169_s11 = int_to_ptr.vmem [resolvable:$true] %s273_s11 }
  0x1b   : > { %s260_s14 = sshll.u32 %s1062_s13, 4  ;;  %s1481_s1 = sld [smem:[#allocation21_spill]]  ;;  %s1171_s14 = int_to_ptr.vmem [resolvable:$true] %s260_s14 }
  0x1c   : > { %p1165_p11 = pnand %p698_p10, %p1468_p1 }
  0x1e   : > { %p1181_p13 = pneg %p1165_p11 }
  0x21   : > { %s788_s17 = scalar_lea.hbm %s1481_s1, 16 }
  0x22   : > { %p789_p12 = scmp.ne.s32.totalorder %s1481_s1, %s788_s17  ;;  %p795_p5 = scmp.lt.u32.totalorder %s788_s17, %s1481_s1 }
  0x24   : > { %p791_p0 = pnand %p1181_p13, %p789_p12 }
  0x26   : > { %p792_p3 = pneg %p791_p0 }
  0x28   : > { %p797_p7 = pnand %p795_p5, %p792_p3 }
  0x2a   : > { %800 = shalt.err (!%p797_p7)
}
  0x2b   : > { %s801_s10 = scalar_lea.vmem %s248_s9, 16  ;;  %s808_s13 = scalar_lea.vmem %s248_s9, 32 }
  0x2c   : > { %p802_p10 = scmp.ne.s32.totalorder %s248_s9, %s801_s10  ;;  %p809_p2 = scmp.lt.s32.totalorder %s248_s9, %s248_s9 }
  0x2d   : > { %p810_p6 = scmp.lt.s32.totalorder %s808_s13, %s801_s10 }
  0x2e   : > { %p804_p9 = pnand %p802_p10, %p1181_p13 }
  0x2f   : > { %p811_p4 = por %p810_p6, %p809_p2 }
  0x30   : > { %p805_p1 = pneg %p804_p9 }
  0x32   : > { %p812_p8 = pnand %p811_p4, %p805_p1 }
  0x34   : > { %815 = shalt.err (!%p812_p8)
}
  0x35   : > { %701 = dma.hbm_to_vmem [thread:$0]  (!%p1165_p11), %s1481_s1, 16, %s248_s9, [#allocation6]  }
  0x36   : > { %s1483_s4 = sld [smem:[#allocation23_spill]] }
  0x3c   : > { %s816_s19 = scalar_lea.hbm %s1483_s4, 16 }
  0x3d   : > { %p817_p9 = scmp.ne.s32.totalorder %s1483_s4, %s816_s19  ;;  %p823_p1 = scmp.lt.u32.totalorder %s816_s19, %s1483_s4 }
  0x3f   : > { %p819_p12 = pnand %p817_p9, %p1181_p13 }
  0x41   : > { %p820_p2 = pneg %p819_p12 }
  0x43   : > { %p825_p4 = pnand %p823_p1, %p820_p2 }
  0x45   : > { %828 = shalt.err (!%p825_p4)
}
  0x46   : > { %s829_s9 = scalar_lea.vmem %s1169_s11, 16  ;;  %s836_s15 = scalar_lea.vmem %s1169_s11, 32 }
  0x47   : > { %p830_p6 = scmp.ne.s32.totalorder %s1169_s11, %s829_s9  ;;  %p837_p3 = scmp.lt.s32.totalorder %s1169_s11, %s1169_s11 }
  0x48   : > { %p838_p5 = scmp.lt.s32.totalorder %s836_s15, %s829_s9 }
  0x49   : > { %p832_p8 = pnand %p830_p6, %p1181_p13 }
  0x4a   : > { %p839_p7 = por %p838_p5, %p837_p3 }
  0x4b   : > { %p833_p0 = pneg %p832_p8 }
  0x4d   : > { %p840_p10 = pnand %p839_p7, %p833_p0 }
  0x4f   : > { %843 = shalt.err (!%p840_p10)
}
  0x50   : > { %707 = dma.hbm_to_vmem [thread:$0]  (!%p1165_p11), %s1483_s4, 16, %s1169_s11, [#allocation9]  }
  0x51   : > { %s1484_s2 = sld [smem:[#allocation22_spill]] }
  0x57   : > { %s844_s28 = scalar_lea.hbm %s1484_s2, 16 }
  0x58   : > { %p845_p9 = scmp.ne.s32.totalorder %s1484_s2, %s844_s28  ;;  %p851_p1 = scmp.lt.u32.totalorder %s844_s28, %s1484_s2 }
  0x5a   : > { %p847_p12 = pnand %p845_p9, %p1181_p13 }
  0x5c   : > { %p848_p2 = pneg %p847_p12 }
  0x5e   : > { %p853_p4 = pnand %p851_p1, %p848_p2 }
  0x60   : > { %856 = shalt.err (!%p853_p4)
}
  0x61   : > { %s857_s11 = scalar_lea.vmem %s1171_s14, 16  ;;  %s864_s15 = scalar_lea.vmem %s1171_s14, 32 }
  0x62   : > { %p858_p6 = scmp.ne.s32.totalorder %s1171_s14, %s857_s11  ;;  %p865_p3 = scmp.lt.s32.totalorder %s1171_s14, %s1171_s14 }
  0x63   : > { %p866_p5 = scmp.lt.s32.totalorder %s864_s15, %s857_s11 }
  0x64   : > { %p860_p8 = pnand %p858_p6, %p1181_p13 }
  0x65   : > { %p867_p7 = por %p866_p5, %p865_p3 }
  0x66   : > { %p861_p0 = pneg %p860_p8 }
  0x68   : > { %p868_p10 = pnand %p867_p7, %p861_p0 }
  0x6a   : > { %871 = shalt.err (!%p868_p10)
}
  0x6b   : > { %704 = dma.hbm_to_vmem [thread:$0]  (!%p1165_p11), %s1484_s2, 16, %s1171_s14, [#allocation6]  }
  0x6c   : > { %s1063_s18 = smov [#allocation11]   ;;  %s1485_s5 = sld [smem:[#allocation24_spill]] }
  0x6d   : > { %s286_s19 = sshll.u32 %s1063_s18, 4  ;;  %s287_s19 = int_to_ptr.vmem [resolvable:$true] %s286_s19 }
  0x72   : > { %s872_s10 = scalar_lea.hbm %s1485_s5, 16 }
  0x73   : > { %p873_p9 = scmp.ne.s32.totalorder %s1485_s5, %s872_s10  ;;  %p879_p1 = scmp.lt.u32.totalorder %s872_s10, %s1485_s5 }
  0x75   : > { %p875_p12 = pnand %p873_p9, %p1181_p13 }
  0x77   : > { %p876_p2 = pneg %p875_p12 }
  0x79   : > { %p881_p4 = pnand %p879_p1, %p876_p2 }
  0x7b   : > { %884 = shalt.err (!%p881_p4)
}
  0x7c   : > { %s885_s14 = scalar_lea.vmem %s287_s19, 16  ;;  %s892_s16 = scalar_lea.vmem %s287_s19, 32 }
  0x7d   : > { %p886_p6 = scmp.ne.s32.totalorder %s287_s19, %s885_s14  ;;  %p893_p3 = scmp.lt.s32.totalorder %s287_s19, %s287_s19 }
  0x7e   : > { %p894_p5 = scmp.lt.s32.totalorder %s892_s16, %s885_s14 }
  0x7f   : > { %p888_p8 = pnand %p886_p6, %p1181_p13 }
  0x80   : > { %p895_p7 = por %p894_p5, %p893_p3 }
  0x81   : > { %p889_p0 = pneg %p888_p8 }
  0x83   : > { %p896_p10 = pnand %p895_p7, %p889_p0 }
  0x85   : > { %899 = shalt.err (!%p896_p10)
}
  0x86   : > { %710 = dma.hbm_to_vmem [thread:$0]  (!%p1165_p11), %s1485_s5, 16, %s287_s19, [#allocation12]  }
  0x87   : > { %s39_s20 = sadd.s32 1, %s1054_s25  ;;  %s48_s28 = sadd.s32 1, %s1046_s23 }
  0x88   : > { %p41_p13 = scmp.ge.s32.totalorder %s39_s20, 2  ;;  %p55_p9 = scmp.ne.s32.totalorder %s1046_s23, %s1042_s22 }
  0x89   : > { %p56_p12 = scmp.eq.s32.totalorder %s1058_s26, 0  ;;  %p726_p2 = scmp.lt.s32.totalorder %s1058_s26, 2 }
  0x8a   : > { %s1507_s20 = smov (%p41_p13, %s39_s20), 0  ;;  %p1486_p4 = scmp.eq.s32.totalorder %s1137_s27, 1 }
  0x8b   : > { %p57_p1 = por %p56_p12, %p55_p9  ;;  %s43_s8 = ssub.s32 %s1054_s25, %s1507_s20 }
  0x8c   : > { %p1273_p6 = por %p1486_p4, %p55_p9  ;;  %s297_s10 = sand.u32 1, %s1046_s23  }
  0x8d   : > { %p46_p11 = scmp.eq.s32.totalorder %s43_s8, 0  ;;  %s1280_s19 = sshll.u32 %s297_s10, 5 }
  0x8e   : > { %s1471_s13 = sshll.u32 %s1054_s25, 9  ;;  %s1488_s0 = sld [smem:[#allocation20_spill]] }
  0x8f   : > { %s1284_s9 = scalar_select %p46_p11, %s1046_s23, %s48_s28  }
  0x90   : > { %s301_s16 = scalar_lea.vmem [#allocation2], %s1280_s19  ;;  %p1296_p8 = pnand %p726_p2, %p57_p1 }
  0x91   : > { %s309_s17 = sshll.u32 %s301_s16, 4  ;;  %s1302_s28 = scalar_lea.sflag [#allocation3], %s297_s10  ;;  %s1300_s17 = int_to_ptr.vmem [resolvable:$true] %s309_s17 }
  0x92   : > { %p902_p3 = pneg %p1296_p8 }
  0x94   : > { %s1291_s14 = scalar_lea.hbm %s1488_s0, %s1471_s13  ;;  %s905_s16 = scalar_lea.hbm %s1488_s0, 1024 }
  0x95   : > { %s900_s8 = scalar_lea.hbm %s1291_s14, 512  ;;  %p906_p10 = scmp.lt.u32.totalorder %s1291_s14, %s1488_s0 }
  0x96   : > { %p901_p0 = scmp.ne.s32.totalorder %s1291_s14, %s900_s8  ;;  %p907_p13 = scmp.lt.u32.totalorder %s905_s16, %s900_s8 }
  0x97   : > { %p909_p12 = scmp.lt.u32.totalorder %s900_s8, %s1291_s14 }
  0x98   : > { %p903_p5 = pnand %p902_p3, %p901_p0  ;;  %p908_p9 = por %p907_p13, %p906_p10 }
  0x9a   : > { %p904_p7 = pneg %p903_p5  ;;  %p910_p2 = por %p909_p12, %p908_p9 }
  0x9c   : > { %p911_p1 = pnand %p910_p2, %p904_p7 }
  0x9e   : > { %914 = shalt.err (!%p911_p1)
}
  0x9f   : > { %s915_s10 = scalar_lea.vmem %s1300_s17, 512  ;;  %s1064_s11 = smov [#allocation2]  }
  0xa0   : > { %p916_p4 = scmp.ne.s32.totalorder %s1300_s17, %s915_s10  ;;  %s920_s15 = sshll.u32 %s1064_s11, 4  ;;  %s921_s15 = int_to_ptr.vmem [resolvable:$false] %s920_s15 }
  0xa1   : > { %s922_s1 = scalar_lea.vmem %s921_s15, 1024  ;;  %p923_p5 = scmp.lt.s32.totalorder %s1300_s17, %s921_s15 }
  0xa2   : > { %p918_p11 = pnand %p916_p4, %p902_p3  ;;  %p924_p10 = scmp.lt.s32.totalorder %s922_s1, %s915_s10 }
  0xa4   : > { %p919_p0 = pneg %p918_p11  ;;  %p925_p13 = por %p924_p10, %p923_p5 }
  0xa6   : > { %p926_p9 = pnand %p925_p13, %p919_p0 }
  0xa8   : > { %929 = shalt.err (!%p926_p9)
}
  0xa9   : > { %s1065_s13 = smov 128   ;;  %s1066_s8 = smov 8  }
  0xaa   : > { %714 = dma.hbm_to_vmem [thread:$0]  (!%p1296_p8), %s1291_s14, 512, %s1300_s17, %s1302_s28, %s1065_s13, %s1065_s13, %s1066_s8  }
  0xab   : > { %s1490_s16 = sshll.u32 %s1054_s25, 9  ;;  %s323_s1 = scalar_lea.vmem [#allocation8], %s1280_s19 }
  0xac   : > { %s1338_s15 = scalar_lea.hbm %s1464_s3, %s1490_s16  ;;  %s331_s0 = sshll.u32 %s323_s1, 4  ;;  %s1342_s0 = int_to_ptr.vmem [resolvable:$true] %s331_s0 }
  0xad   : > { %s319_s2 = sand.u32 1, %s1058_s26   ;;  %s930_s5 = scalar_lea.hbm %s1338_s15, 512 }
  0xae   : > { %s1344_s4 = scalar_lea.sflag [#allocation9], %s319_s2  ;;  %p931_p7 = scmp.ne.s32.totalorder %s1338_s15, %s930_s5 }
  0xaf   : > { %s935_s28 = scalar_lea.hbm %s1464_s3, 1024  ;;  %p936_p1 = scmp.lt.u32.totalorder %s1338_s15, %s1464_s3 }
  0xb0   : > { %p933_p12 = pnand %p931_p7, %p902_p3  ;;  %p937_p4 = scmp.lt.u32.totalorder %s935_s28, %s930_s5 }
  0xb1   : > { %p939_p0 = scmp.lt.u32.totalorder %s930_s5, %s1338_s15 }
  0xb2   : > { %p934_p2 = pneg %p933_p12  ;;  %p938_p11 = por %p937_p4, %p936_p1 }
  0xb4   : > { %p940_p5 = por %p939_p0, %p938_p11 }
  0xb6   : > { %p941_p10 = pnand %p940_p5, %p934_p2 }
  0xb8   : > { %944 = shalt.err (!%p941_p10)
}
  0xb9   : > { %s945_s2 = scalar_lea.vmem %s1342_s0, 512  ;;  %s1067_s19 = smov [#allocation8]  }
  0xba   : > { %p946_p13 = scmp.ne.s32.totalorder %s1342_s0, %s945_s2  ;;  %s950_s11 = sshll.u32 %s1067_s19, 4  ;;  %s951_s11 = int_to_ptr.vmem [resolvable:$false] %s950_s11 }
  0xbb   : > { %s952_s1 = scalar_lea.vmem %s951_s11, 1024  ;;  %p953_p12 = scmp.lt.s32.totalorder %s1342_s0, %s951_s11 }
  0xbc   : > { %p948_p9 = pnand %p946_p13, %p902_p3  ;;  %p954_p1 = scmp.lt.s32.totalorder %s952_s1, %s945_s2 }
  0xbe   : > { %p949_p7 = pneg %p948_p9  ;;  %p955_p4 = por %p954_p1, %p953_p12 }
  0xc0   : > { %p956_p11 = pnand %p955_p4, %p949_p7 }
  0xc2   : > { %959 = shalt.err (!%p956_p11)
}
  0xc3   : > { %717 = dma.hbm_to_vmem [thread:$0]  (!%p1296_p8), %s1338_s15, 512, %s1342_s0, %s1344_s4, %s1065_s13, %s1065_s13, %s1066_s8  }
  0xc4   : > { %p1491_p3 = scmp.ne.s32.totalorder %s1479_s7, 0 }
  0xc5   : > { %s1376_s5 = sand.u32 (!%p1491_p3), 1, %s1042_s22   ;;  %p1492_p2 = scmp.ne.s32.totalorder (!%p1491_p3), %s1477_s29, 0 }
  0xc6   : > { %343 = sbr.rel (%p1491_p3) target bundleno = 245 (0xf5), region = 44  ;;  %s1379_s14 = sshll.u32 (!%p1491_p3), %s1376_s5, 5 }
  0xc7   : > { %s346_s18 = scalar_lea.sflag (!%p1491_p3), [#allocation3], %s1376_s5  ;;  %s349_s17 = scalar_lea.vmem (!%p1491_p3), [#allocation2], %s1379_s14 }
  0xcd   : > { %1013 = dma.done.wait (%p1492_p2), %s346_s18, 512  }
  0xce   : > { %1015 = vsyncadd (%p1492_p2), %s346_s18, 4294966784  ;;  %p1493_p8 = scmp.eq.s32.totalorder %s1137_s27, 0 }
  0xd0   : > { %1017 = dma.done.wait (%p1493_p8), [#allocation6], 32   ;;  %p1494_p0 = pmov %p1493_p8 }
  0xd1   : > { %s362_s0 = sand.u32 1, %s1137_s27   ;;  %s366_s7 = scalar_lea.vmem [#allocation8], %s1379_s14 }
  0xd2   : > { %1019 = vsyncadd (%p1494_p0), [#allocation6], 4294967264  ;;  %s363_s4 = scalar_lea.sflag [#allocation9], %s362_s0 }
  0xd3   : > { %1021 = dma.done.wait (%p1492_p2), %s363_s4, 512  }
  0xd4   : > { %1023 = vsyncadd (%p1492_p2), %s363_s4, 4294966784  ;;  %p1495_p5 = pmov %p1494_p0 }
  0xd5   : > { %p1496_p10 = pmov %p1494_p0 }
  0xd6   : > { %1025 = dma.done.wait (%p1495_p5), [#allocation9], 16  }
  0xd7   : > { %1027 = vsyncadd (%p1496_p10), [#allocation9], 4294967280  ;;  %p1497_p13 = pmov %p1494_p0 }
  0xd8   : > { %p1498_p9 = pmov %p1494_p0 }
  0xd9   : > { %1029 = dma.done.wait (%p1497_p13), [#allocation12], 16  }
  0xda   : > { %1031 = vsyncadd (%p1498_p9), [#allocation12], 4294967280  ;;  %v411_v0 = vld [vmem:[%s349_s17] sm:$0xff]  ;;  %v412_v7 = vld [vmem:[%s349_s17 + $0x8] sm:$0xff]  ;;  %s407_s27 = scalar_lea.vmem [#allocation13], %s1379_s14  ;;  %s675_s13 = sshll.u32 %s1050_s24, 9 }
  0xdb   : > { %v664_v1 = vld [vmem:[#allocation5] ss:$0 sm:$0xff]  ;;  %v665_v2 = vld [vmem:[#allocation7] ss:$0 sm:$0xff]  ;;  %v437_v4 = vld [vmem:[%s366_s7] sm:$0xff]  ;;  %s486_s29 = sshll.u32 %s407_s27, 4  ;;  %s1412_s28 = scalar_lea.hbm %s1467_s6, %s675_s13  ;;  %s1407_s29 = int_to_ptr.vmem [resolvable:$true] %s486_s29 }
  0xdc   : > { %v422_v3 = vmul.f32 %v664_v1, %v411_v0  ;;  %v666_v5 = vld [vmem:[#allocation10] ss:$0 sm:$0xff]  ;;  %v438_v8 = vld [vmem:[%s366_s7 + $0x8] sm:$0xff]  ;;  %v423_v11 = vmul.f32 %v664_v1, %v412_v7  ;;  %v439_v14 = vld [vmem:[%s366_s7 + $0x10] sm:$0xff]  ;;  %s472_s24 = scalar_lea.sflag [#allocation4], %s1376_s5  ;;  %s960_s16 = scalar_lea.vmem %s1407_s29, 512 }
  0xdd   : > { %v448_v6 = vmul.f32 %v666_v5, %v437_v4  ;;  %v413_v9 = vld [vmem:[%s349_s17 + $0x10] sm:$0xff]  ;;  %v449_v12 = vmul.f32 %v666_v5, %v438_v8  ;;  %v414_v15 = vld [vmem:[%s349_s17 + $0x18] sm:$0xff]  ;;  %v667_v17 = vld [vmem:[#allocation11] ss:$0 sm:$0xff]  ;;  %v450_v18 = vmul.f32 %v666_v5, %v439_v14  ;;  %p961_p7 = scmp.ne.s32.totalorder %s1407_s29, %s960_s16  ;;  %s1068_s10 = smov [#allocation13]  }
  0xde   : > { %v433_v10 = vadd.f32 %v665_v2, %v422_v3  ;;  %v424_v13 = vmul.f32 %v664_v1, %v413_v9  ;;  %v440_v16 = vld [vmem:[%s366_s7 + $0x18] sm:$0xff]  ;;  %v425_v19 = vmul.f32 %v664_v1, %v414_v15  ;;  %v434_v22 = vadd.f32 %v665_v2, %v423_v11  ;;  %s964_s2 = sshll.u32 %s1068_s10, 4  ;;  %s965_s2 = int_to_ptr.vmem [resolvable:$false] %s964_s2 }
  0xdf   : > { %v451_v20 = vmul.f32 %v666_v5, %v440_v16  ;;  %p962_p12 = pnand %p961_p7, %p1273_p6  ;;  %s966_s19 = scalar_lea.vmem %s965_s2, 1024 }
  0xe0   : > { %v452_v21 = vadd.f32 %v448_v6, %v433_v10  ;;  %v435_v23 = vadd.f32 %v665_v2, %v424_v13  ;;  %v436_v24 = vadd.f32 %v665_v2, %v425_v19  ;;  %v453_v26 = vadd.f32 %v449_v12, %v434_v22  ;;  %p967_p4 = scmp.lt.s32.totalorder %s1407_s29, %s965_s2  ;;  %p968_p11 = scmp.lt.s32.totalorder %s966_s19, %s960_s16 }
  0xe1   : > { %p963_p1 = pneg %p962_p12 }
  0xe2   : > { %v463_v25 = vadd.f32 %v667_v17, %v452_v21  ;;  %v454_v27 = vadd.f32 %v450_v18, %v435_v23  ;;  %v455_v28 = vadd.f32 %v451_v20, %v436_v24  ;;  %v464_v29 = vadd.f32 %v667_v17, %v453_v26  ;;  %p969_p3 = por %p968_p11, %p967_p4 }
  0xe4   : > { %467 = vst [vmem:[%s407_s27] sm:$0xff] %v463_v25  ;;  %v465_v30 = vadd.f32 %v667_v17, %v454_v27  ;;  %v466_v31 = vadd.f32 %v667_v17, %v455_v28  ;;  %468 = vst [vmem:[%s407_s27 + $0x8] sm:$0xff] %v464_v29  ;;  %p970_p2 = pnand %p969_p3, %p963_p1 }
  0xe6   : > { %469 = vst [vmem:[%s407_s27 + $0x10] sm:$0xff] %v465_v30  ;;  %470 = vst [vmem:[%s407_s27 + $0x18] sm:$0xff] %v466_v31 }
  0xe7   : > { %973 = shalt.err (!%p970_p2)
}
  0xe8   : > { %s974_s11 = scalar_lea.hbm %s1412_s28, 512  ;;  %s978_s18 = scalar_lea.hbm %s1467_s6, 1024 }
  0xe9   : > { %p975_p8 = scmp.ne.s32.totalorder %s1412_s28, %s974_s11  ;;  %p979_p10 = scmp.lt.u32.totalorder %s1412_s28, %s1467_s6 }
  0xea   : > { %p980_p13 = scmp.lt.u32.totalorder %s978_s18, %s974_s11  ;;  %p982_p7 = scmp.lt.u32.totalorder %s974_s11, %s1412_s28 }
  0xeb   : > { %p976_p0 = pnand %p975_p8, %p1273_p6 }
  0xec   : > { %p981_p9 = por %p980_p13, %p979_p10 }
  0xed   : > { %p977_p5 = pneg %p976_p0 }
  0xee   : > { %p983_p12 = por %p982_p7, %p981_p9 }
  0xf0   : > { %p984_p1 = pnand %p983_p12, %p977_p5 }
  0xf2   : > { %987 = shalt.err (!%p984_p1)
}
  0xf3   : > { %s1069_s4 = smov 128   ;;  %s1070_s7 = smov 8  }
  0xf4   : > { %696 = dma.vmem_to_hbm [thread:$0]  (%p1273_p6), %s1407_s29, 512, %s1412_s28, %s472_s24, %s1069_s4, %s1069_s4, %s1070_s7  }
  0xf5 PF: > { %s501_s27 = sand.u32 1, %s1038_s21   ;;  %p1499_p4 = scmp.ne.s32.totalorder %s1478_s30, 0 }
  0xf6   : > { %p1500_p11 = scmp.ge.s32.totalorder %s1058_s26, 2  ;;  %s502_s13 = scalar_lea.sflag [#allocation4], %s501_s27 }
  0xf8   : > { %p719_p3 = pnand %p1500_p11, %p1499_p4 }
  0xfa   : > { %1033 = dma.done.wait (!%p719_p3), %s502_s13, 512  }
  0xfb   : > { %1035 = vsyncadd (!%p719_p3), %s502_s13, 4294966784  ;;  %s27_s26 = sadd.s32 1, %s1058_s26   ;;  %s1501_s21 = smov %s1042_s22 }
  0xfc   : > { %p24_p2 = scmp.ge.s32.totalorder %s27_s26, 4   ;;  %s1502_s22 = smov %s1046_s23 }
  0xfd   : > { %s1503_s23 = smov %s1284_s9  ;;  %s1504_s24 = smov %s1054_s25 }
  0xfe   : > { %s1505_s25 = smov %s1507_s20  ;;  %26 = sbr.rel (!%p24_p2) target bundleno = 16 (0x10), region = 122 }
 0x105   :  { %507 = vsyncpa [#allocation3], 1 }
 0x106   :  { %509 = vsyncpa [#allocation3 + $0x1], 1 }
 0x107   :  { %510 = vsyncpa [#allocation6], 1 }
 0x108   :  { %511 = vsyncpa [#allocation9], 1 }
 0x109   :  { %513 = vsyncpa [#allocation9 + $0x1], 1 }
 0x10a   :  { %514 = vsyncpa [#allocation12], 1 }
 0x10b   :  { %515 = vsyncpa [#allocation4], 1 }
 0x10c   :  { %517 = vsyncpa [#allocation4 + $0x1], 1 }

// kernel: residual_conv_forward.10
= control target key start
LH: loop header
LB: loop body
LE: loop exit
PB: predicated region body
PF: predicated region fallthrough
CT: control target
= control target key end

     0   :  { %11 = vsyncpa [#allocation4], 0  ;;  %s1574_s0 = inlined_call_operand.hbm [shape: f32[64,128], index: 0, kind: input, shape index: {}]   ;;  %s1575_s1 = inlined_call_operand.hbm [shape: f32[1,128], index: 1, kind: input, shape index: {}]   ;;  %s1576_s2 = inlined_call_operand.hbm [shape: f32[1,128], index: 2, kind: input, shape index: {}]   ;;  %s1577_s3 = inlined_call_operand.hbm [shape: f32[128,128], index: 3, kind: input, shape index: {}]   ;;  %s1578_s4 = inlined_call_operand.hbm [shape: f32[64,128], index: 4, kind: output, shape index: {0}]   ;;  %s1579_s5 = inlined_call_operand.hbm [shape: f32[2,2,128], index: 5, kind: output, shape index: {1}]  }
   0x1   :  { %13 = vsyncpa [#allocation4 + $0x1], 0 }
   0x2   :  { %14 = vsyncpa [#allocation7], 0 }
   0x3   :  { %15 = vsyncpa [#allocation10], 0 }
   0x4   :  { %16 = vsyncpa [#allocation5], 0 }
   0x5   :  { %18 = vsyncpa [#allocation5 + $0x1], 0 }
   0x6   :  { %19 = vsyncpa [#allocation13], 0 }
   0x7   :  { %21 = vsyncpa [#allocation13 + $0x1], 0  ;;  %s1249_s18 = smov 0   ;;  %s1251_s19 = smov 0  }
   0x8   :  { %s1253_s20 = smov 0   ;;  %s1255_s21 = smov 0  }
   0x9   :  { %s1257_s22 = smov 0   ;;  %s1259_s23 = smov 0  }
   0xa LB: > { %s735_s24 = sadd.s32 4294967295, %s1207_s23   ;;  %s736_s25 = sadd.s32 4294967294, %s1207_s23   ;;  %s1207_s23 = sphi %s1259_s23, %s27_s23   ;;  %s1203_s22 = sphi %s1257_s22, %s1605_s22   ;;  %s1199_s21 = sphi %s1255_s21, %s1604_s21   ;;  %s1195_s20 = sphi %s1253_s20, %s1603_s20   ;;  %s1191_s19 = sphi %s1251_s19, %s1602_s19   ;;  %s1187_s18 = sphi %s1249_s18, %s1601_s18  }
   0xb   : > { %p68_p0 = scmp.ne.s32.totalorder %s1191_s19, %s1187_s18  ;;  %p1283_p1 = scmp.eq.s32.totalorder %s735_s24, 0 }
   0xc   : > { %p1287_p2 = scmp.eq.s32.totalorder %s735_s24, 1  ;;  %p180_p3 = scmp.eq.s32.totalorder %s736_s25, 1 }
   0xd   : > { %s1585_s26 = scalar_select %p1283_p1, 1, 0 }
   0xe   : > { %s1586_s27 = scalar_select %p1287_p2, 1, 0 }
   0xf   : > { %p1293_p4 = por %p1283_p1, %p68_p0  ;;  %p737_p5 = scmp.ge.s32.totalorder %s1207_s23, 1 }
  0x10   : > { %p1298_p6 = por %p180_p3, %p68_p0  ;;  %p215_p7 = scmp.lt.s32.totalorder %s1207_s23, 3 }
  0x11   : > { %s1587_s28 = scalar_select %p1293_p4, 1, 0 }
  0x12   : > { %s1588_s29 = scalar_select %p1298_p6, 1, 0 }
  0x13   : > { %p1303_p8 = pnand %p737_p5, %p215_p7  ;;  %s1209_s6 = smov [#allocation6]  }
  0x14   : > { %s230_s7 = sshll.u32 %s1209_s6, 4  ;;  %s1210_s8 = smov [#allocation8]   ;;  %s231_s7 = int_to_ptr.vmem [resolvable:$true] %s230_s7 }
  0x15   : > { %s1589_s30 = scalar_select %p1303_p8, 1, 0 }
  0x16   : > { %p887_p10 = pneg %p1303_p8  ;;  %s243_s9 = sshll.u32 %s1210_s8, 4  ;;  %s1316_s9 = int_to_ptr.vmem [resolvable:$true] %s243_s9 }
  0x17   : > { %s1211_s11 = smov [#allocation9]   ;;  %s971_s15 = scalar_lea.hbm %s1575_s1, 16 }
  0x18   : > { %p1312_p11 = pnand %p887_p10, %p1283_p1  ;;  %s257_s12 = sshll.u32 %s1211_s11, 4  ;;  %s1318_s12 = int_to_ptr.vmem [resolvable:$true] %s257_s12 }
  0x19   : > { %p972_p12 = scmp.ne.s32.totalorder %s1575_s1, %s971_s15  ;;  %p978_p5 = scmp.lt.u32.totalorder %s971_s15, %s1575_s1 }
  0x1a   : > { %p1328_p13 = pneg %p1312_p11 }
  0x1c   : > { %p974_p0 = pnand %p1328_p13, %p972_p12 }
  0x1e   : > { %p975_p3 = pneg %p974_p0 }
  0x20   : > { %p980_p7 = pnand %p978_p5, %p975_p3 }
  0x22   : > { %983 = shalt.err (!%p980_p7)
}
  0x23   : > { %s984_s8 = scalar_lea.vmem %s231_s7, 16  ;;  %s991_s11 = scalar_lea.vmem %s231_s7, 32 }
  0x24   : > { %p985_p10 = scmp.ne.s32.totalorder %s231_s7, %s984_s8  ;;  %p992_p1 = scmp.lt.s32.totalorder %s231_s7, %s231_s7 }
  0x25   : > { %p993_p4 = scmp.lt.s32.totalorder %s991_s11, %s984_s8 }
  0x26   : > { %p987_p9 = pnand %p985_p10, %p1328_p13 }
  0x27   : > { %p994_p8 = por %p993_p4, %p992_p1 }
  0x28   : > { %p988_p6 = pneg %p987_p9 }
  0x2a   : > { %p995_p2 = pnand %p994_p8, %p988_p6 }
  0x2c   : > { %998 = shalt.err (!%p995_p2)
}
  0x2d   : > { %890 = dma.hbm_to_vmem [thread:$0]  (!%p1312_p11), %s1575_s1, 16, %s231_s7, [#allocation7]  }
  0x2e   : > { %s999_s17 = scalar_lea.hbm %s1576_s2, 16 }
  0x2f   : > { %p1000_p9 = scmp.ne.s32.totalorder %s1576_s2, %s999_s17  ;;  %p1006_p2 = scmp.lt.u32.totalorder %s999_s17, %s1576_s2 }
  0x31   : > { %p1002_p12 = pnand %p1000_p9, %p1328_p13 }
  0x33   : > { %p1003_p1 = pneg %p1002_p12 }
  0x35   : > { %p1008_p4 = pnand %p1006_p2, %p1003_p1 }
  0x37   : > { %1011 = shalt.err (!%p1008_p4)
}
  0x38   : > { %s1012_s7 = scalar_lea.vmem %s1316_s9, 16  ;;  %s1019_s13 = scalar_lea.vmem %s1316_s9, 32 }
  0x39   : > { %p1013_p6 = scmp.ne.s32.totalorder %s1316_s9, %s1012_s7  ;;  %p1020_p3 = scmp.lt.s32.totalorder %s1316_s9, %s1316_s9 }
  0x3a   : > { %p1021_p5 = scmp.lt.s32.totalorder %s1019_s13, %s1012_s7 }
  0x3b   : > { %p1015_p8 = pnand %p1013_p6, %p1328_p13 }
  0x3c   : > { %p1022_p7 = por %p1021_p5, %p1020_p3 }
  0x3d   : > { %p1016_p0 = pneg %p1015_p8 }
  0x3f   : > { %p1023_p10 = pnand %p1022_p7, %p1016_p0 }
  0x41   : > { %1026 = shalt.err (!%p1023_p10)
}
  0x42   : > { %893 = dma.hbm_to_vmem [thread:$0]  (!%p1312_p11), %s1576_s2, 16, %s1316_s9, [#allocation7]  }
  0x43   : > { %s1027_s25 = scalar_lea.hbm %s1577_s3, 2048 }
  0x44   : > { %p1028_p9 = scmp.ne.s32.totalorder %s1577_s3, %s1027_s25  ;;  %p1034_p2 = scmp.lt.u32.totalorder %s1027_s25, %s1577_s3 }
  0x46   : > { %p1030_p12 = pnand %p1028_p9, %p1328_p13 }
  0x48   : > { %p1031_p1 = pneg %p1030_p12 }
  0x4a   : > { %p1036_p4 = pnand %p1034_p2, %p1031_p1 }
  0x4c   : > { %1039 = shalt.err (!%p1036_p4)
}
  0x4d   : > { %s1040_s9 = scalar_lea.vmem %s1318_s12, 2048  ;;  %p1048_p3 = scmp.lt.s32.totalorder %s1318_s12, %s1318_s12 }
  0x4e   : > { %p1041_p6 = scmp.ne.s32.totalorder %s1318_s12, %s1040_s9  ;;  %p1049_p5 = scmp.lt.s32.totalorder %s1040_s9, %s1040_s9 }
  0x50   : > { %p1043_p8 = pnand %p1041_p6, %p1328_p13  ;;  %p1050_p7 = por %p1049_p5, %p1048_p3 }
  0x52   : > { %p1044_p0 = pneg %p1043_p8 }
  0x54   : > { %p1051_p10 = pnand %p1050_p7, %p1044_p0 }
  0x56   : > { %1054 = shalt.err (!%p1051_p10)
}
  0x57   : > { %s1584_s13 = smov 128   ;;  %s1213_s24 = smov 8  }
  0x58   : > { %896 = dma.hbm_to_vmem [thread:$0]  (!%p1312_p11), %s1577_s3, 2048, %s1318_s12, [#allocation10], %s1584_s13, %s1584_s13, %s1213_s24  }
  0x59   : > { %s55_s16 = sadd.s32 1, %s1195_s20  ;;  %s46_s17 = sadd.s32 1, %s1203_s22 }
  0x5a   : > { %p62_p13 = scmp.ne.s32.totalorder %s1195_s20, %s1191_s19  ;;  %p48_p9 = scmp.ge.s32.totalorder %s46_s17, 2 }
  0x5b   : > { %p63_p12 = scmp.eq.s32.totalorder %s1207_s23, 0  ;;  %p1592_p1 = scmp.ne.s32.totalorder %s1586_s27, 0 }
  0x5c   : > { %p911_p4 = scmp.lt.s32.totalorder %s1207_s23, 2  ;;  %s1607_s17 = smov (%p48_p9, %s46_s17), 0 }
  0x5d   : > { %p1401_p2 = por %p1592_p1, %p62_p13  ;;  %p64_p6 = por %p63_p12, %p62_p13 }
  0x5e   : > { %s271_s10 = sand.u32 1, %s1195_s20   ;;  %s50_s6 = ssub.s32 %s1203_s22, %s1607_s17 }
  0x5f   : > { %p53_p8 = scmp.eq.s32.totalorder %s50_s6, 0  ;;  %s742_s12 = sshll.u32 %s271_s10, 5 }
  0x60   : > { %s761_s8 = sshll.u32 %s1203_s22, 9  ;;  %s275_s14 = scalar_lea.vmem [#allocation3], %s742_s12 }
  0x61   : > { %s1413_s11 = scalar_select %p53_p8, %s1195_s20, %s55_s16  }
  0x62   : > { %s1418_s27 = scalar_lea.hbm %s1574_s0, %s761_s8  ;;  %s283_s15 = sshll.u32 %s275_s14, 4  ;;  %s1420_s15 = int_to_ptr.vmem [resolvable:$true] %s283_s15 }
  0x63   : > { %p1424_p11 = pnand %p911_p4, %p64_p6  ;;  %s1428_s16 = scalar_lea.sflag [#allocation4], %s271_s10 }
  0x64   : > { %s1055_s7 = scalar_lea.hbm %s1418_s27, 512  ;;  %s1060_s9 = scalar_lea.hbm %s1574_s0, 1024 }
  0x65   : > { %p1056_p0 = scmp.ne.s32.totalorder %s1418_s27, %s1055_s7  ;;  %p1057_p3 = pneg %p1424_p11 }
  0x66   : > { %p1061_p10 = scmp.lt.u32.totalorder %s1418_s27, %s1574_s0  ;;  %p1062_p13 = scmp.lt.u32.totalorder %s1060_s9, %s1055_s7 }
  0x67   : > { %p1058_p5 = pnand %p1057_p3, %p1056_p0  ;;  %p1064_p12 = scmp.lt.u32.totalorder %s1055_s7, %s1418_s27 }
  0x68   : > { %p1063_p9 = por %p1062_p13, %p1061_p10 }
  0x69   : > { %p1059_p7 = pneg %p1058_p5 }
  0x6a   : > { %p1065_p1 = por %p1064_p12, %p1063_p9 }
  0x6c   : > { %p1066_p4 = pnand %p1065_p1, %p1059_p7 }
  0x6e   : > { %1069 = shalt.err (!%p1066_p4)
}
  0x6f   : > { %s1070_s10 = scalar_lea.vmem %s1420_s15, 512  ;;  %s1214_s12 = smov [#allocation3]  }
  0x70   : > { %p1071_p6 = scmp.ne.s32.totalorder %s1420_s15, %s1070_s10  ;;  %s1075_s8 = sshll.u32 %s1214_s12, 4  ;;  %s1076_s8 = int_to_ptr.vmem [resolvable:$false] %s1075_s8 }
  0x71   : > { %s1077_s13 = scalar_lea.vmem %s1076_s8, 1024  ;;  %p1078_p5 = scmp.lt.s32.totalorder %s1420_s15, %s1076_s8 }
  0x72   : > { %p1073_p8 = pnand %p1071_p6, %p1057_p3  ;;  %p1079_p10 = scmp.lt.s32.totalorder %s1077_s13, %s1070_s10 }
  0x74   : > { %p1074_p0 = pneg %p1073_p8  ;;  %p1080_p13 = por %p1079_p10, %p1078_p5 }
  0x76   : > { %p1081_p9 = pnand %p1080_p13, %p1074_p0 }
  0x78   : > { %1084 = shalt.err (!%p1081_p9)
}
  0x79   : > { %s1595_s7 = smov 128   ;;  %p1596_p3 = scmp.ne.s32.totalorder %s1589_s30, 0 }
  0x7a   : > { %900 = dma.hbm_to_vmem [thread:$0]  (!%p1424_p11), %s1418_s27, 512, %s1420_s15, %s1428_s16, %s1595_s7, %s1595_s7, %s1213_s24  }
  0x7b   : > { %295 = sbr.rel (%p1596_p3) target bundleno = 430 (0x1ae), region = 36  ;;  %s1462_s9 = sand.u32 (!%p1596_p3), 1, %s1191_s19  }
  0x7c   : > { %s746_s14 = sshll.u32 (!%p1596_p3), %s1462_s9, 5  ;;  %s298_s10 = scalar_lea.sflag (!%p1596_p3), [#allocation4], %s1462_s9 }
  0x7d   : > { %s1468_s6 = scalar_lea.vmem (!%p1596_p3), [#allocation3], %s746_s14  ;;  %p1597_p7 = scmp.ne.s32.totalorder (!%p1596_p3), %s1587_s28, 0 }
  0x82   : > { %1166 = dma.done.wait (%p1597_p7), %s298_s10, 512  }
  0x83   : > { %1168 = vsyncadd (%p1597_p7), %s298_s10, 4294966784  ;;  %p1598_p11 = scmp.ne.s32.totalorder %s1585_s26, 0 }
  0x85   : > { %1170 = dma.done.wait (%p1598_p11), [#allocation7], 32  }
  0x86   : > { %1172 = vsyncadd (%p1598_p11), [#allocation7], 4294967264 }
  0x87   : > { %1174 = dma.done.wait (%p1598_p11), [#allocation10], 2048  }
  0x88   : > { %1176 = vsyncadd (%p1598_p11), [#allocation10], 4294965248  ;;  %v398_v0 = vld [vmem:[#allocation9] sm:$0xff]  ;;  %v399_v1 = vld [vmem:[#allocation9 + $0x8] sm:$0xff]  ;;  %s337_s26 = scalar_lea.vmem [#allocation11], %s746_s14  ;;  %s762_s30 = sshll.u32 %s1199_s21, 9 }
  0x89   : > { %v400_v2 = vld [vmem:[#allocation9 + $0x10] sm:$0xff]  ;;  %v821_v3 = vpack.c.bf16 %v399_v1, %v398_v0  ;;  %v401_v4 = vld [vmem:[#allocation9 + $0x18] sm:$0xff]  ;;  %v402_v6 = vld [vmem:[#allocation9 + $0x20] sm:$0xff]  ;;  %s563_s28 = sshll.u32 %s337_s26, 4  ;;  %s1494_s15 = scalar_lea.hbm %s1578_s4, %s762_s30  ;;  %s1489_s28 = int_to_ptr.vmem [resolvable:$true] %s563_s28 }
  0x8a   : > { %v825_v5 = vpack.c.bf16 %v401_v4, %v400_v2  ;;  %v403_v7 = vld [vmem:[#allocation9 + $0x28] sm:$0xff]  ;;  %v404_v9 = vld [vmem:[#allocation9 + $0x30] sm:$0xff]  ;;  %v356_v10 = vld [vmem:[%s1468_s6] sm:$0xff]  ;;  %s544_s16 = scalar_lea.sflag [#allocation5], %s1462_s9  ;;  %s1085_s12 = scalar_lea.vmem %s1489_s28, 512 }
  0x8b   : > { %822 = vmatprep.subr.bf16.mxu0 %v821_v3  ;;  %853 = vmatprep.subr.bf16.mxu1 %v821_v3  ;;  %v829_v8 = vpack.c.bf16 %v403_v7, %v402_v6  ;;  %v752_v11 = vld [vmem:[#allocation6] ss:$0 sm:$0xff]  ;;  %v753_v14 = vld [vmem:[#allocation8] ss:$0 sm:$0xff]  ;;  %v358_v15 = vld [vmem:[%s1468_s6 + $0x10] sm:$0xff]  ;;  %p1086_p12 = scmp.ne.s32.totalorder %s1489_s28, %s1085_s12  ;;  %s1215_s8 = smov [#allocation11]  }
  0x8c   : > { %824 = vmatpush3.bf16.msra.mxu0 %v821_v3  ;;  %861 = vmatpush3.bf16.msra.mxu1 %v821_v3  ;;  %v405_v12 = vld [vmem:[#allocation9 + $0x38] sm:$0xff]  ;;  %v367_v13 = vmul.f32 %v752_v11, %v356_v10  ;;  %v369_v16 = vmul.f32 %v752_v11, %v358_v15  ;;  %v406_v20 = vld [vmem:[#allocation9 + $0x40] sm:$0xff]  ;;  %v407_v21 = vld [vmem:[#allocation9 + $0x48] sm:$0xff]  ;;  %s1089_s13 = sshll.u32 %s1215_s8, 4  ;;  %s1090_s13 = int_to_ptr.vmem [resolvable:$false] %s1089_s13 }
  0x8d   : > { %826 = vmatprep.subr.bf16.mxu0 %v825_v5  ;;  %854 = vmatprep.subr.bf16.mxu1 %v825_v5  ;;  %v833_v18 = vpack.c.bf16 %v405_v12, %v404_v9  ;;  %v837_v25 = vpack.c.bf16 %v407_v21, %v406_v20  ;;  %v408_v27 = vld [vmem:[#allocation9 + $0x50] sm:$0xff]  ;;  %v409_v28 = vld [vmem:[#allocation9 + $0x58] sm:$0xff]  ;;  %v357_v30 = vld [vmem:[%s1468_s6 + $0x8] sm:$0xff]  ;;  %p1087_p1 = pnand %p1086_p12, %p1401_p2  ;;  %s1091_s7 = scalar_lea.vmem %s1090_s13, 1024 }
  0x8e   : > { %v378_v17 = vadd.f32 %v753_v14, %v367_v13  ;;  %v380_v19 = vadd.f32 %v753_v14, %v369_v16  ;;  %v841_v29 = vpack.c.bf16 %v409_v28, %v408_v27  ;;  %v359_v31 = vld [vmem:[%s1468_s6 + $0x18] sm:$0xff]  ;;  %v410_v32 = vld [vmem:[#allocation9 + $0x60] sm:$0xff]  ;;  %v411_v33 = vld [vmem:[#allocation9 + $0x68] sm:$0xff]  ;;  %v368_v34 = vmul.f32 %v752_v11, %v357_v30  ;;  %p1092_p6 = scmp.lt.s32.totalorder %s1489_s28, %s1090_s13  ;;  %p1093_p8 = scmp.lt.s32.totalorder %s1091_s7, %s1085_s12 }
  0x8f   : > { %v370_v35 = vmul.f32 %v752_v11, %v359_v31  ;;  %v845_v36 = vpack.c.bf16 %v411_v33, %v410_v32  ;;  %v412_v37 = vld [vmem:[#allocation9 + $0x70] sm:$0xff]  ;;  %v413_v38 = vld [vmem:[#allocation9 + $0x78] sm:$0xff]  ;;  %p1088_p4 = pneg %p1087_p1 }
  0x90   : > { %828 = vmatpush3.bf16.msra.mxu0 %v825_v5  ;;  %862 = vmatpush3.bf16.msra.mxu1 %v825_v5  ;;  %vm382_vm0 = vcmp.ge.f32.partialorder %v378_v17, 0.0  ;;  %v386_v22 = vmul.f32 0.2, %v378_v17  ;;  %vm384_vm1 = vcmp.ge.f32.partialorder %v380_v19, 0.0  ;;  %v388_v23 = vmul.f32 0.2, %v380_v19  ;;  %p1094_p0 = por %p1093_p8, %p1092_p6 }
  0x91   : > { %830 = vmatprep.subr.bf16.mxu0 %v829_v8  ;;  %855 = vmatprep.subr.bf16.mxu1 %v829_v8  ;;  %v379_v39 = vadd.f32 %v753_v14, %v368_v34  ;;  %v381_v40 = vadd.f32 %v753_v14, %v370_v35  ;;  %v849_v41 = vpack.c.bf16 %v413_v38, %v412_v37 }
  0x92   : > { %v390_v24 = vsel %vm382_vm0, %v378_v17, %v386_v22  ;;  %v392_v26 = vsel %vm384_vm1, %v380_v19, %v388_v23  ;;  %p1095_p5 = pnand %p1094_p0, %p1088_p4 }
  0x93   : > { %815 = vmatprep.mubr.f32.mxu0 %v390_v24  ;;  %818 = vmatprep.mubr.f32.mxu1 %v392_v26  ;;  %v387_v42 = vmul.f32 0.2, %v379_v39  ;;  %v389_v43 = vmul.f32 0.2, %v381_v40  ;;  %vm383_vm2 = vcmp.ge.f32.partialorder %v379_v39, 0.0  ;;  %vm385_vm3 = vcmp.ge.f32.partialorder %v381_v40, 0.0 }
  0x94   : > { %832 = vmatpush3.bf16.msra.mxu0 %v829_v8  ;;  %863 = vmatpush3.bf16.msra.mxu1 %v829_v8 }
  0x95   : > { %834 = vmatprep.subr.bf16.mxu0 %v833_v18  ;;  %856 = vmatprep.subr.bf16.mxu1 %v833_v18  ;;  %v391_v44 = vsel %vm383_vm2, %v379_v39, %v387_v42  ;;  %v393_v45 = vsel %vm385_vm3, %v381_v40, %v389_v43 }
  0x98   : > { %836 = vmatpush3.bf16.msra.mxu0 %v833_v18  ;;  %864 = vmatpush3.bf16.msra.mxu1 %v833_v18 }
  0x99   : > { %838 = vmatprep.subr.bf16.mxu0 %v837_v25  ;;  %857 = vmatprep.subr.bf16.mxu1 %v837_v25 }
  0x9c   : > { %840 = vmatpush3.bf16.msra.mxu0 %v837_v25  ;;  %865 = vmatpush3.bf16.msra.mxu1 %v837_v25 }
  0x9d   : > { %842 = vmatprep.subr.bf16.mxu0 %v841_v29  ;;  %858 = vmatprep.subr.bf16.mxu1 %v841_v29 }
  0xa0   : > { %844 = vmatpush3.bf16.msra.mxu0 %v841_v29  ;;  %866 = vmatpush3.bf16.msra.mxu1 %v841_v29 }
  0xa1   : > { %846 = vmatprep.subr.bf16.mxu0 %v845_v36  ;;  %859 = vmatprep.subr.bf16.mxu1 %v845_v36 }
  0xa4   : > { %848 = vmatpush3.bf16.msra.mxu0 %v845_v36  ;;  %867 = vmatpush3.bf16.msra.mxu1 %v845_v36 }
  0xa5   : > { %850 = vmatprep.subr.bf16.mxu0 %v849_v41  ;;  %860 = vmatprep.subr.bf16.mxu1 %v849_v41 }
  0xa8   : > { %852 = vmatpush3.bf16.msra.mxu0 %v849_v41  ;;  %868 = vmatpush3.bf16.msra.mxu1 %v849_v41 }
  0xab   : > { %816 = vmatmul.mubr.f32.vlgmr.msra.gmra.mrb[0].mxu0 %v391_v44  ;;  %819 = vmatmul.mubr.f32.vlgmr.msra.gmra.mrb[0].mxu1 %v393_v45 }
 0x17e   : > { %v817_v46 = vpop.f32.mrb[0].mxu0  ;;  %v820_v47 = vpop.f32.mrb[0].mxu1 }
 0x17f   : > { %515 = vst [vmem:[%s337_s26 + $0x8] sm:$0xff] %v817_v46  ;;  %v528_v48 = vmul.f32 %v817_v46, %v817_v46  ;;  %v480_v49 = vpop.f32.mrb[1].mxu0  ;;  %517 = vst [vmem:[%s337_s26 + $0x18] sm:$0xff] %v820_v47  ;;  %v490_v50 = vpop.f32.mrb[1].mxu1 }
 0x180   : > { %514 = vst [vmem:[%s337_s26] sm:$0xff] %v480_v49  ;;  %v518_v51 = vadd.f32 %v817_v46, %v480_v49  ;;  %v527_v52 = vmul.f32 %v480_v49, %v480_v49  ;;  %516 = vst [vmem:[%s337_s26 + $0x10] sm:$0xff] %v490_v50  ;;  %v529_v53 = vmul.f32 %v490_v50, %v490_v50 }
 0x181   : > { %1098 = shalt.err (!%p1095_p5)
}
 0x182   : > { %s1099_s14 = scalar_lea.hbm %s1494_s15, 512  ;;  %s1103_s26 = scalar_lea.hbm %s1578_s4, 1024 }
 0x183   : > { %p1100_p10 = scmp.ne.s32.totalorder %s1494_s15, %s1099_s14  ;;  %p1104_p3 = scmp.lt.u32.totalorder %s1494_s15, %s1578_s4 }
 0x184   : > { %p1105_p7 = scmp.lt.u32.totalorder %s1103_s26, %s1099_s14  ;;  %p1107_p12 = scmp.lt.u32.totalorder %s1099_s14, %s1494_s15 }
 0x185   : > { %p1101_p13 = pnand %p1100_p10, %p1401_p2 }
 0x186   : > { %p1106_p11 = por %p1105_p7, %p1104_p3 }
 0x187   : > { %p1102_p9 = pneg %p1101_p13 }
 0x188   : > { %p1108_p1 = por %p1107_p12, %p1106_p11 }
 0x18a   : > { %p1109_p4 = pnand %p1108_p1, %p1102_p9 }
 0x18c   : > { %1112 = shalt.err (!%p1109_p4)
}
 0x18d   : > { %s1216_s27 = smov 128   ;;  %s1217_s12 = smov 8   ;;  %v531_v54 = vadd.f32 %v528_v48, %v527_v52  ;;  %v519_v55 = vadd.f32 %v518_v51, %v490_v50  ;;  %v530_v56 = vmul.f32 %v820_v47, %v820_v47  ;;  %vm540_vm4 = vcmask 1040384  }
 0x18e   : > { %883 = dma.vmem_to_hbm [thread:$0]  (%p1401_p2), %s1489_s28, 512, %s1494_s15, %s544_s16, %s1216_s27, %s1216_s27, %s1217_s12  }
 0x18f   : > { %v520_v57 = vadd.f32 %v820_v47, %v519_v55  ;;  %v532_v58 = vadd.f32 %v531_v54, %v529_v53  ;;  %s751_s8 = sshll.u32 %s1462_s9, 1  ;;  %s758_s28 = sshll.u32 %s1199_s21, 5 }
 0x190   : > { %s344_s15 = scalar_lea.vmem [#allocation12], %s751_s8  ;;  %s1525_s14 = scalar_lea.hbm %s1579_s5, %s758_s28 }
 0x191   : > { %v521_v59 = vrot.slane %v520_v57, 4  ;;  %v533_v60 = vadd.f32 %v532_v58, %v530_v56  ;;  %s580_s16 = sshll.u32 %s344_s15, 4  ;;  %s549_s10 = scalar_lea.sflag [#allocation13], %s1462_s9  ;;  %s1527_s16 = int_to_ptr.vmem [resolvable:$true] %s580_s16 }
 0x192   : > { %s1113_s6 = scalar_lea.vmem %s1527_s16, 32  ;;  %s1218_s21 = smov [#allocation12]  }
 0x193   : > { %v522_v61 = vadd.f32 %v521_v59, %v520_v57  ;;  %v534_v62 = vrot.slane %v533_v60, 4  ;;  %p1114_p6 = scmp.ne.s32.totalorder %s1527_s16, %s1113_s6  ;;  %s1117_s26 = sshll.u32 %s1218_s21, 4  ;;  %s1118_s26 = int_to_ptr.vmem [resolvable:$false] %s1117_s26 }
 0x194   : > { %s1119_s30 = scalar_lea.vmem %s1118_s26, 64  ;;  %p1120_p5 = scmp.lt.s32.totalorder %s1527_s16, %s1118_s26 }
 0x195   : > { %v523_v63 = vrot.slane %v522_v61, 2  ;;  %v535_v0 = vadd.f32 %v534_v62, %v533_v60  ;;  %p1115_p8 = pnand %p1114_p6, %p1401_p2  ;;  %p1121_p10 = scmp.lt.s32.totalorder %s1119_s30, %s1113_s6 }
 0x197   : > { %v524_v1 = vadd.f32 %v523_v63, %v522_v61  ;;  %v536_v2 = vrot.slane %v535_v0, 2  ;;  %p1116_p0 = pneg %p1115_p8  ;;  %p1122_p13 = por %p1121_p10, %p1120_p5 }
 0x199   : > { %v525_v3 = vrot.slane %v524_v1, 1  ;;  %v537_v4 = vadd.f32 %v536_v2, %v535_v0  ;;  %p1123_p9 = pnand %p1122_p13, %p1116_p0 }
 0x19b   : > { %v538_v5 = vrot.slane %v537_v4, 1  ;;  %v526_v6 = vadd.f32 %v525_v3, %v524_v1 }
 0x19d   : > { %v539_v7 = vadd.f32 %v538_v5, %v537_v4 }
 0x19f   : > { %v541_v8 = vsel %vm540_vm4, %v526_v6, %v539_v7 }
 0x1a0   : > { %542 = vst [vmem:[%s344_s15] sm:$0x3] %v541_v8 }
 0x1a1   : > { %1126 = shalt.err (!%p1123_p9)
}
 0x1a2   : > { %s1127_s9 = scalar_lea.hbm %s1525_s14, 32  ;;  %s1131_s12 = scalar_lea.hbm %s1579_s5, 64 }
 0x1a3   : > { %p1128_p3 = scmp.ne.s32.totalorder %s1525_s14, %s1127_s9  ;;  %p1132_p12 = scmp.lt.u32.totalorder %s1525_s14, %s1579_s5 }
 0x1a4   : > { %p1133_p1 = scmp.lt.u32.totalorder %s1131_s12, %s1127_s9  ;;  %p1135_p6 = scmp.lt.u32.totalorder %s1127_s9, %s1525_s14 }
 0x1a5   : > { %p1129_p7 = pnand %p1128_p3, %p1401_p2 }
 0x1a6   : > { %p1134_p4 = por %p1133_p1, %p1132_p12 }
 0x1a7   : > { %p1130_p11 = pneg %p1129_p7 }
 0x1a8   : > { %p1136_p8 = por %p1135_p6, %p1134_p4 }
 0x1aa   : > { %p1137_p0 = pnand %p1136_p8, %p1130_p11 }
 0x1ac   : > { %1140 = shalt.err (!%p1137_p0)
}
 0x1ad   : > { %884 = dma.vmem_to_hbm [thread:$0]  (%p1401_p2), %s1527_s16, 32, %s1525_s14, %s549_s10  }
 0x1ae PF: > { %s592_s15 = sand.u32 1, %s1187_s18   ;;  %p1599_p5 = scmp.ne.s32.totalorder %s1588_s29, 0 }
 0x1af   : > { %p1600_p10 = scmp.ge.s32.totalorder %s1207_s23, 2  ;;  %s593_s13 = scalar_lea.sflag [#allocation5], %s592_s15 }
 0x1b1   : > { %p902_p13 = pnand %p1600_p10, %p1599_p5 }
 0x1b3   : > { %1178 = dma.done.wait (!%p902_p13), %s593_s13, 512  }
 0x1b4   : > { %1180 = vsyncadd (!%p902_p13), %s593_s13, 4294966784  ;;  %s602_s7 = scalar_lea.sflag [#allocation13], %s592_s15 }
 0x1b5   : > { %1182 = dma.done.wait (!%p902_p13), %s602_s7, 32  }
 0x1b6   : > { %1184 = vsyncadd (!%p902_p13), %s602_s7, 4294967264  ;;  %s27_s23 = sadd.s32 1, %s1207_s23   ;;  %s1601_s18 = smov %s1191_s19 }
 0x1b7   : > { %p24_p9 = scmp.ge.s32.totalorder %s27_s23, 4   ;;  %s1602_s19 = smov %s1195_s20 }
 0x1b8   : > { %s1603_s20 = smov %s1413_s11  ;;  %s1604_s21 = smov %s1203_s22 }
 0x1b9   : > { %s1605_s22 = smov %s1607_s17  ;;  %26 = sbr.rel (!%p24_p9) target bundleno = 10 (0xa), region = 121 }
 0x1c0   :  { %607 = vsyncpa [#allocation4], 1 }
 0x1c1   :  { %609 = vsyncpa [#allocation4 + $0x1], 1 }
 0x1c2   :  { %610 = vsyncpa [#allocation7], 1 }
 0x1c3   :  { %611 = vsyncpa [#allocation10], 1 }
 0x1c4   :  { %612 = vsyncpa [#allocation5], 1 }
 0x1c5   :  { %614 = vsyncpa [#allocation5 + $0x1], 1 }
 0x1c6   :  { %615 = vsyncpa [#allocation13], 1 }
 0x1c7   :  { %617 = vsyncpa [#allocation13 + $0x1], 1 }

</bundles_post_ra>
